<compile_context>
chip_gen: v6e
topology: v6e:2x2x1
jax: 0.10.0
libtpu: 0.0.40
codegen_flags: <defaults>
</compile_context>

<pallas_src>
import functools

import jax
import jax.numpy as jnp
from jax.experimental import pallas as pl
from jax.experimental.pallas import tpu as pltpu


def _get_act(name):
    if name == "tanh":
        return jnp.tanh
    if name == "relu":
        return lambda h: jnp.maximum(h, 0.0)
    if name == "swish":
        return lambda h: h * jax.nn.sigmoid(h)
    if name == "leakyrelu":
        return lambda h: jnp.where(h >= 0, h, 0.01 * h)  # F.leaky_relu default slope
    raise ValueError(f"unknown act: {name}")


def _make_energy_kernel(n_hidden, sigma, act_name, out_dtype):
    act = _get_act(act_name)
    inv_two_sigma_sq = 1.0 / (2.0 * float(sigma) ** 2)

    def kernel(*refs):
        # refs = (x, W0, b0, W1, b1, ..., W_out, b_out, o)
        x_ref = refs[0]
        o_ref = refs[-1]

        x = x_ref[...]                        # f32 (tile_b, D); kept exact for residual
        h = x.astype(jnp.bfloat16)            # bf16 only at the MXU inputs
        for li in range(n_hidden):
            w = refs[1 + 2 * li][...]         # bf16 (in, H_pad), VMEM-resident
            b = refs[2 + 2 * li][...]         # f32  (1, H_pad), broadcasts over rows
            z = jnp.dot(h, w, preferred_element_type=jnp.float32) + b   # f32 accum
            h = act(z).astype(jnp.bfloat16)   # activation math stays f32 (v5e EUP/VPU)
            # TODO(synk): BatchNorm1d (if_bn=True) path not implemented; default
            # if_bn=False uses Identity which is a no-op and is simply elided here.

        w_out = refs[1 + 2 * n_hidden][...]   # bf16 (H_pad, D)
        b_out = refs[2 + 2 * n_hidden][...]   # f32  (1, D)
        y = jnp.dot(h, w_out, preferred_element_type=jnp.float32) + b_out

        d = y - x                             # f32
        e = jnp.sum(d * d, axis=-1, keepdims=True) * inv_two_sigma_sq   # (tile_b, 1)
        o_ref[...] = e.astype(out_dtype)

    return kernel


def _round_up(v, m):
    return ((v + m - 1) // m) * m


def _pad_to(a, shape):
    pads = [(0, t - s) for s, t in zip(a.shape, shape)]
    if all(p == (0, 0) for p in pads):
        return a
    return jnp.pad(a, pads)


def _vmem_capacity_bytes():
    try:
        cap = getattr(pltpu.get_tpu_info(), "vmem_capacity_bytes", None)
        if cap:
            return int(cap)
    except Exception:
        pass
    return 64 * 1024 * 1024  # conservative fallback (v7x per-TC VMEM)


def energy_net_forward(x, hidden_ws, hidden_bs, w_out, b_out, *, sigma=0.1, act="swish"):
    """Fused EnergyNet forward. hidden_ws[i]: (in, h), hidden_bs[i]: (h,),
    w_out: (h, input_dim), b_out: (input_dim,). Returns energies of shape (B,)."""
    input_dim = w_out.shape[1]
    h_dim = w_out.shape[0]
    n_hidden = len(hidden_ws)

    x2d = x.reshape(-1, input_dim).astype(jnp.float32)
    B, D = x2d.shape

    # --- pad hidden width to a lane multiple (e.g. 400 -> 512), pre-cast to bf16 ----
    # Exact: padded pre-activations are 0 (zero weight cols + zero bias), act(0)==0,
    # and padded w_out rows are zero so they contribute nothing to the output.
    H_pad = _round_up(h_dim, 128)
    ws_p, bs_p = [], []
    fan_in = D
    for w, b in zip(hidden_ws, hidden_bs):
        ws_p.append(_pad_to(w.astype(jnp.float32), (fan_in, H_pad)).astype(jnp.bfloat16))
        bs_p.append(_pad_to(b.astype(jnp.float32), (H_pad,)).reshape(1, H_pad))
        fan_in = H_pad
    w_out_p = _pad_to(w_out.astype(jnp.float32), (H_pad, D)).astype(jnp.bfloat16)
    b_out_p = b_out.astype(jnp.float32).reshape(1, D)

    # --- generation-aware VMEM limit and batch-tile sizing ---------------------------
    vmem_cap = _vmem_capacity_bytes()
    # ~75% of physical, capped: ~80 MiB on 128 MiB parts (v5e/v6e), 48 MiB on v7x.
    vmem_limit = max(32 << 20, min(int(0.75 * vmem_cap), 80 << 20))

    # Resident parameter footprint (constant-index blocks are still double-buffered).
    # TODO(synk): pipeline_mode=pl.Buffered(1) on the weight specs would reclaim the
    # second buffer; skipped to stay conservative on lowering support.
    param_bytes = (sum(w.size for w in ws_p) + w_out_p.size) * 2 \
                  + (sum(b.size for b in bs_p) + b_out_p.size) * 4
    resident_bytes = 2 * param_bytes

    # Per-row live bytes: streamed x (double-buffered) + f32/bf16 activation copies.
    per_row_bytes = (3 * 4 * D             # x f32 stream (2 bufs) + tile held for residual
                     + 2 * D               # bf16 copy of x for the first matmul
                     + 4 * H_pad + 2 * H_pad   # hidden activation f32 + bf16
                     + 2 * 4 * D)          # y and d in f32
    budget = vmem_limit - resident_bytes - (4 << 20)   # headroom for internal scratch
    tile_b = max(8, min(4096, (budget // per_row_bytes) // 8 * 8))

    if B <= tile_b:
        if B <= 8:
            tile_b = B          # full-extent block (satisfies the (8,128) rule)
        else:
            # Keep at least 2 grid steps so both v7x TensorCores get work.
            tile_b = max(8, _round_up(pl.cdiv(B, 2), 8))
    grid = (pl.cdiv(B, tile_b),)

    out_dtype = jnp.float32
    kernel = _make_energy_kernel(n_hidden, sigma, act, out_dtype)

    # --- block specs ------------------------------------------------------------------
    in_specs = [pl.BlockSpec((tile_b, D), lambda i: (i, 0))]          # streamed x tile
    for w, b in zip(ws_p, bs_p):
        in_specs.append(pl.BlockSpec(w.shape, lambda i: (0, 0)))      # resident weights
        in_specs.append(pl.BlockSpec(b.shape, lambda i: (0, 0)))
    in_specs.append(pl.BlockSpec(w_out_p.shape, lambda i: (0, 0)))
    in_specs.append(pl.BlockSpec(b_out_p.shape, lambda i: (0, 0)))
    # TODO(synk): a lane-dense (1, tile_b) output block would avoid masked vst in the
    # epilogue; kept as (tile_b, 1) since the epilogue is a tiny fraction of step time.
    out_specs = pl.BlockSpec((tile_b, 1), lambda i: (i, 0))

    flat_args = [x2d]
    for w, b in zip(ws_p, bs_p):
        flat_args += [w, b]
    flat_args += [w_out_p, b_out_p]

    out2d = pl.pallas_call(
        kernel,
        out_shape=jax.ShapeDtypeStruct((B, 1), out_dtype),
        grid=grid,
        in_specs=in_specs,
        out_specs=out_specs,
        compiler_params=pltpu.CompilerParams(
            dimension_semantics=("parallel",),
            vmem_limit_bytes=int(vmem_limit),
        ),
    )(*flat_args)

    return out2d.reshape(B)


def _reference_forward(x, hidden_ws, hidden_bs, w_out, b_out, *, sigma=0.1, act="swish"):
    act_fn = _get_act(act)
    input_dim = w_out.shape[1]
    x2d = x.reshape(-1, input_dim).astype(jnp.float32)
    h = x2d
    for w, b in zip(hidden_ws, hidden_bs):
        h = act_fn(h @ w + b)
    y = h @ w_out + b_out
    return jnp.sum((y - x2d) ** 2, axis=-1) / (2.0 * sigma ** 2)


def init_energy_net_params(key, input_dim=784, h_dim=400, h_layer_num=1):
    """Linear params as (in, out) matrices (equivalent to PyTorch's x @ W.T + b)."""
    hidden_ws, hidden_bs = [], []
    fan_in = input_dim
    for _ in range(h_layer_num + 1):
        key, kw, kb = jax.random.split(key, 3)
        bound = 1.0 / (fan_in ** 0.5)
        hidden_ws.append(jax.random.uniform(kw, (fan_in, h_dim), jnp.float32, -bound, bound))
        hidden_bs.append(jax.random.uniform(kb, (h_dim,), jnp.float32, -bound, bound))
        fan_in = h_dim
    key, kw, kb = jax.random.split(key, 3)
    bound = 1.0 / (h_dim ** 0.5)
    w_out = jax.random.uniform(kw, (h_dim, input_dim), jnp.float32, -bound, bound)
    b_out = jax.random.uniform(kb, (input_dim,), jnp.float32, -bound, bound)
    return hidden_ws, hidden_bs, w_out, b_out


if __name__ == "__main__":
    key = jax.random.PRNGKey(0)
    key, kx, kp = jax.random.split(key, 3)

    input_dim, h_dim, h_layer_num, sigma, act = 784, 400, 1, 0.1, "swish"
    batch = 8

    x = jax.random.normal(kx, (batch, input_dim), dtype=jnp.float32)
    hidden_ws, hidden_bs, w_out, b_out = init_energy_net_params(
        kp, input_dim=input_dim, h_dim=h_dim, h_layer_num=h_layer_num)

    fwd = functools.partial(energy_net_forward, sigma=sigma, act=act)
    y = fwd(x, hidden_ws, hidden_bs, w_out, b_out)
    jax.block_until_ready(y)

    y_ref = _reference_forward(x, hidden_ws, hidden_bs, w_out, b_out, sigma=sigma, act=act)
    jax.block_until_ready(y_ref)

    assert y.shape == (batch,)
    assert y.dtype == jnp.float32
    # bf16 matmul inputs with f32 accumulation; energies are O(1e4) so rtol dominates.
    assert jnp.allclose(y, y_ref, rtol=5e-3, atol=1e-1), (y, y_ref)

    print("KERNEL_OK")
</pallas_src>

<mosaic_0001>
module attributes {stable_mosaic.version = 11 : i64} {
  func.func @kernel(%arg0: i32, %arg1: memref<8x784xf32, #tpu.memory_space<vmem>>, %arg2: memref<784x512xbf16, #tpu.memory_space<vmem>>, %arg3: memref<1x512xf32, #tpu.memory_space<vmem>>, %arg4: memref<512x512xbf16, #tpu.memory_space<vmem>>, %arg5: memref<1x512xf32, #tpu.memory_space<vmem>>, %arg6: memref<512x784xbf16, #tpu.memory_space<vmem>>, %arg7: memref<1x784xf32, #tpu.memory_space<vmem>>, %arg8: memref<8x1xf32, #tpu.memory_space<vmem>>) attributes {dimension_semantics = [#tpu.dimension_semantics<parallel>], iteration_bounds = array<i64: 1>, scalar_prefetch = 0 : i64, scratch_operands = 0 : i64, tpu.core_type = #tpu.core_type<tc>, window_params = [{transform_indices = @transform_0, window_bounds = array<i64: 8, 784>}, {pipeline_mode = #tpu.pipeline_mode<synchronous>, transform_indices = @transform_1, window_bounds = array<i64: 784, 512>}, {pipeline_mode = #tpu.pipeline_mode<synchronous>, transform_indices = @transform_2, window_bounds = array<i64: 1, 512>}, {pipeline_mode = #tpu.pipeline_mode<synchronous>, transform_indices = @transform_3, window_bounds = array<i64: 512, 512>}, {pipeline_mode = #tpu.pipeline_mode<synchronous>, transform_indices = @transform_4, window_bounds = array<i64: 1, 512>}, {pipeline_mode = #tpu.pipeline_mode<synchronous>, transform_indices = @transform_5, window_bounds = array<i64: 512, 784>}, {pipeline_mode = #tpu.pipeline_mode<synchronous>, transform_indices = @transform_6, window_bounds = array<i64: 1, 784>}, {transform_indices = @transform_7, window_bounds = array<i64: 8, 1>}]} {
    %c0 = arith.constant 0 : index
    %c0_0 = arith.constant 0 : index
    %0 = vector.load %arg1[%c0, %c0_0] : memref<8x784xf32, #tpu.memory_space<vmem>>, vector<8x784xf32>
    %1 = arith.truncf %0 : vector<8x784xf32> to vector<8x784xbf16>
    %c0_1 = arith.constant 0 : index
    %c0_2 = arith.constant 0 : index
    %2 = vector.load %arg2[%c0_1, %c0_2] : memref<784x512xbf16, #tpu.memory_space<vmem>>, vector<784x512xbf16>
    %c0_3 = arith.constant 0 : index
    %c0_4 = arith.constant 0 : index
    %3 = vector.load %arg3[%c0_3, %c0_4] : memref<1x512xf32, #tpu.memory_space<vmem>>, vector<1x512xf32>
    %cst = arith.constant dense<0.000000e+00> : vector<8x512xf32>
    %4 = tpu.matmul %1, %2, %cst {dimension_numbers = #tpu.dot_dimension_numbers<[1], [0], [0], [1], [0, 0, 1, 1], [], []>} : vector<8x784xbf16>, vector<784x512xbf16>, vector<8x512xf32> -> vector<8x512xf32>
    %5 = vector.broadcast %3 : vector<1x512xf32> to vector<8x512xf32>
    %6 = arith.addf %4, %5 : vector<8x512xf32>
    %7 = arith.negf %6 : vector<8x512xf32>
    %8 = math.exp %7 : vector<8x512xf32>
    %cst_5 = arith.constant 1.000000e+00 : f32
    %9 = vector.broadcast %cst_5 : f32 to vector<8x512xf32>
    %10 = arith.addf %9, %8 : vector<8x512xf32>
    %11 = arith.divf %9, %10 : vector<8x512xf32>
    %12 = arith.mulf %6, %11 : vector<8x512xf32>
    %13 = arith.truncf %12 : vector<8x512xf32> to vector<8x512xbf16>
    %c0_6 = arith.constant 0 : index
    %c0_7 = arith.constant 0 : index
    %14 = vector.load %arg4[%c0_6, %c0_7] : memref<512x512xbf16, #tpu.memory_space<vmem>>, vector<512x512xbf16>
    %c0_8 = arith.constant 0 : index
    %c0_9 = arith.constant 0 : index
    %15 = vector.load %arg5[%c0_8, %c0_9] : memref<1x512xf32, #tpu.memory_space<vmem>>, vector<1x512xf32>
    %cst_10 = arith.constant dense<0.000000e+00> : vector<8x512xf32>
    %16 = tpu.matmul %13, %14, %cst_10 {dimension_numbers = #tpu.dot_dimension_numbers<[1], [0], [0], [1], [0, 0, 1, 1], [], []>} : vector<8x512xbf16>, vector<512x512xbf16>, vector<8x512xf32> -> vector<8x512xf32>
    %17 = vector.broadcast %15 : vector<1x512xf32> to vector<8x512xf32>
    %18 = arith.addf %16, %17 : vector<8x512xf32>
    %19 = arith.negf %18 : vector<8x512xf32>
    %20 = math.exp %19 : vector<8x512xf32>
    %cst_11 = arith.constant 1.000000e+00 : f32
    %21 = vector.broadcast %cst_11 : f32 to vector<8x512xf32>
    %22 = arith.addf %21, %20 : vector<8x512xf32>
    %23 = arith.divf %21, %22 : vector<8x512xf32>
    %24 = arith.mulf %18, %23 : vector<8x512xf32>
    %25 = arith.truncf %24 : vector<8x512xf32> to vector<8x512xbf16>
    %c0_12 = arith.constant 0 : index
    %c0_13 = arith.constant 0 : index
    %26 = vector.load %arg6[%c0_12, %c0_13] : memref<512x784xbf16, #tpu.memory_space<vmem>>, vector<512x784xbf16>
    %c0_14 = arith.constant 0 : index
    %c0_15 = arith.constant 0 : index
    %27 = vector.load %arg7[%c0_14, %c0_15] : memref<1x784xf32, #tpu.memory_space<vmem>>, vector<1x784xf32>
    %cst_16 = arith.constant dense<0.000000e+00> : vector<8x784xf32>
    %28 = tpu.matmul %25, %26, %cst_16 {dimension_numbers = #tpu.dot_dimension_numbers<[1], [0], [0], [1], [0, 0, 1, 1], [], []>} : vector<8x512xbf16>, vector<512x784xbf16>, vector<8x784xf32> -> vector<8x784xf32>
    %29 = vector.broadcast %27 : vector<1x784xf32> to vector<8x784xf32>
    %30 = arith.addf %28, %29 : vector<8x784xf32>
    %31 = arith.subf %30, %0 : vector<8x784xf32>
    %32 = arith.mulf %31, %31 : vector<8x784xf32>
    %cst_17 = arith.constant dense<0.000000e+00> : vector<8xf32>
    %33 = vector.multi_reduction <add>, %32, %cst_17 [1] : vector<8x784xf32> to vector<8xf32>
    %34 = vector.shape_cast %33 : vector<8xf32> to vector<8x1xf32>
    %cst_18 = arith.constant 5.000000e+01 : f32
    %35 = vector.broadcast %cst_18 : f32 to vector<8x1xf32>
    %36 = arith.mulf %34, %35 : vector<8x1xf32>
    %c0_19 = arith.constant 0 : index
    %c0_20 = arith.constant 0 : index
    %37 = vector.load %arg8[%c0_19, %c0_20] : memref<8x1xf32, #tpu.memory_space<vmem>>, vector<8x1xf32>
    tpu.vector_store %arg8[%c0_19, %c0_20], %36 {strides = array<i32>} : memref<8x1xf32, #tpu.memory_space<vmem>>, vector<8x1xf32>,
    return
  }
  func.func @transform_0(%arg0: i32) -> (i32, i32) {
    %c0_i32 = arith.constant 0 : i32
    %c0_i32_0 = arith.constant 0 : i32
    return %arg0, %c0_i32 : i32, i32
  }
  func.func @transform_1(%arg0: i32) -> (i32, i32) {
    %c0_i32 = arith.constant 0 : i32
    %c0_i32_0 = arith.constant 0 : i32
    %c0_i32_1 = arith.constant 0 : i32
    return %c0_i32, %c0_i32_0 : i32, i32
  }
  func.func @transform_2(%arg0: i32) -> (i32, i32) {
    %c0_i32 = arith.constant 0 : i32
    %c0_i32_0 = arith.constant 0 : i32
    %c0_i32_1 = arith.constant 0 : i32
    return %c0_i32, %c0_i32_0 : i32, i32
  }
  func.func @transform_3(%arg0: i32) -> (i32, i32) {
    %c0_i32 = arith.constant 0 : i32
    %c0_i32_0 = arith.constant 0 : i32
    %c0_i32_1 = arith.constant 0 : i32
    return %c0_i32, %c0_i32_0 : i32, i32
  }
  func.func @transform_4(%arg0: i32) -> (i32, i32) {
    %c0_i32 = arith.constant 0 : i32
    %c0_i32_0 = arith.constant 0 : i32
    %c0_i32_1 = arith.constant 0 : i32
    return %c0_i32, %c0_i32_0 : i32, i32
  }
  func.func @transform_5(%arg0: i32) -> (i32, i32) {
    %c0_i32 = arith.constant 0 : i32
    %c0_i32_0 = arith.constant 0 : i32
    %c0_i32_1 = arith.constant 0 : i32
    return %c0_i32, %c0_i32_0 : i32, i32
  }
  func.func @transform_6(%arg0: i32) -> (i32, i32) {
    %c0_i32 = arith.constant 0 : i32
    %c0_i32_0 = arith.constant 0 : i32
    %c0_i32_1 = arith.constant 0 : i32
    return %c0_i32, %c0_i32_0 : i32, i32
  }
  func.func @transform_7(%arg0: i32) -> (i32, i32) {
    %c0_i32 = arith.constant 0 : i32
    %c0_i32_0 = arith.constant 0 : i32
    return %arg0, %c0_i32 : i32, i32
  }
}

</mosaic_0001>

<bundles_post_ra>
// kernel: tpu_custom_call.1
= control target key start
LH: loop header
LB: loop body
LE: loop exit
PB: predicated region body
PF: predicated region fallthrough
CT: control target
= control target key end

     0   :  { %vm1239_vm0 = vcmask 130048   ;;  %vm4384_vm1 = vcmask 7168   ;;  %s7707_s1 = inlined_call_operand.vmem [shape: bf16[784,512], index: 1, kind: input, shape index: {}]   ;;  %s7708_s0 = inlined_call_operand.vmem [shape: f32[8,784], index: 0, kind: input, shape index: {}]   ;;  %s7709_s3 = inlined_call_operand.vmem [shape: bf16[512,512], index: 3, kind: input, shape index: {}]   ;;  %s7710_s2 = inlined_call_operand.vmem [shape: f32[1,512], index: 2, kind: input, shape index: {}]   ;;  %s7711_s5 = inlined_call_operand.vmem [shape: bf16[512,784], index: 5, kind: input, shape index: {}]   ;;  %s7712_s4 = inlined_call_operand.vmem [shape: f32[1,512], index: 4, kind: input, shape index: {}]   ;;  %s7713_s6 = inlined_call_operand.vmem [shape: f32[1,784], index: 6, kind: input, shape index: {}]   ;;  %s7714_s7 = inlined_call_operand.vmem [shape: f32[8,1], index: 7, kind: output, shape index: {}]  }
   0x1   :  { %v4993_v0 = vld [vmem:[%s7707_s1 + $0xe4] ss:$16 sps:$4 sm:$0xff]   ;;  %v4997_v2 = vld [vmem:[%s7707_s1 + $0xe0] ss:$16 sps:$4 sm:$0xff]   ;;  %v28_v46 = vld [vmem:[%s7708_s0 + $0x8] sm:$0xff] }
   0x2   :  { %v4995_v1 = vld [vmem:[%s7707_s1 + $0x2e4] ss:$16 sps:$4 sm:$0xff]   ;;  %1243 = vmatprep.subr.bf16.mxu0 %v4993_v0  ;;  %v4998_v3 = vld [vmem:[%s7707_s1 + $0x2e0] ss:$16 sps:$4 sm:$0xff]   ;;  %v6026_v49 = vpack.c.bf16 %v28_v46, %v28_v46  ;;  %v30_v50 = vld [vmem:[%s7708_s0 + $0x18] sm:$0xff] }
   0x3   :  { %1284 = vmatprep.subr.bf16.mxu1 %v4995_v1  ;;  %v4999_v4 = vld [vmem:[%s7707_s1 + $0xc4] ss:$16 sps:$4 sm:$0xff]   ;;  %1244 = vmatpush1.bf16.msra.mxu0 %v4997_v2  ;;  %v5003_v6 = vld [vmem:[%s7707_s1 + $0xc0] ss:$16 sps:$4 sm:$0xff]   ;;  %v6034_v52 = vpack.c.bf16 %v30_v50, %v30_v50 }
   0x4   :  { %1285 = vmatpush1.bf16.msra.mxu1 %v4998_v3  ;;  %v5001_v5 = vld [vmem:[%s7707_s1 + $0x2c4] ss:$16 sps:$4 sm:$0xff]   ;;  %1245 = vmatprep.subr.bf16.mxu0 %v4999_v4  ;;  %v5004_v7 = vld [vmem:[%s7707_s1 + $0x2c0] ss:$16 sps:$4 sm:$0xff]  }
   0x5   :  { %1286 = vmatprep.subr.bf16.mxu1 %v5001_v5  ;;  %v5005_v8 = vld [vmem:[%s7707_s1 + $0xa4] ss:$16 sps:$4 sm:$0xff]   ;;  %v5009_v10 = vld [vmem:[%s7707_s1 + $0xa0] ss:$16 sps:$4 sm:$0xff]   ;;  %1275 = vmatprep.mubr.bf16.mxu0 %v6026_v49 }
   0x6   :  { %v5007_v9 = vld [vmem:[%s7707_s1 + $0x2a4] ss:$16 sps:$4 sm:$0xff]   ;;  %v5010_v11 = vld [vmem:[%s7707_s1 + $0x2a0] ss:$16 sps:$4 sm:$0xff]   ;;  %1316 = vmatprep.mubr.bf16.mxu1 %v6034_v52 }
   0x7   :  { %1246 = vmatpush1.bf16.msra.mxu0 %v5003_v6  ;;  %v5011_v12 = vld [vmem:[%s7707_s1 + $0x84] ss:$16 sps:$4 sm:$0xff]   ;;  %v5015_v14 = vld [vmem:[%s7707_s1 + $0x80] ss:$16 sps:$4 sm:$0xff]  }
   0x8   :  { %1287 = vmatpush1.bf16.msra.mxu1 %v5004_v7  ;;  %1247 = vmatprep.subr.bf16.mxu0 %v5005_v8  ;;  %v5013_v13 = vld [vmem:[%s7707_s1 + $0x284] ss:$16 sps:$4 sm:$0xff]   ;;  %v5016_v15 = vld [vmem:[%s7707_s1 + $0x280] ss:$16 sps:$4 sm:$0xff]  }
   0x9   :  { %1288 = vmatprep.subr.bf16.mxu1 %v5007_v9  ;;  %v5017_v16 = vld [vmem:[%s7707_s1 + $0x64] ss:$16 sps:$4 sm:$0xff]   ;;  %v5021_v18 = vld [vmem:[%s7707_s1 + $0x60] ss:$16 sps:$4 sm:$0xff]  }
   0xa   :  { %v5019_v17 = vld [vmem:[%s7707_s1 + $0x264] ss:$16 sps:$4 sm:$0xff]   ;;  %v5022_v19 = vld [vmem:[%s7707_s1 + $0x260] ss:$16 sps:$4 sm:$0xff]  }
   0xb   :  { %1248 = vmatpush1.bf16.msra.mxu0 %v5009_v10  ;;  %v5023_v20 = vld [vmem:[%s7707_s1 + $0x44] ss:$16 sps:$4 sm:$0xff]   ;;  %v5027_v22 = vld [vmem:[%s7707_s1 + $0x40] ss:$16 sps:$4 sm:$0xff]  }
   0xc   :  { %1289 = vmatpush1.bf16.msra.mxu1 %v5010_v11  ;;  %1249 = vmatprep.subr.bf16.mxu0 %v5011_v12  ;;  %v5025_v21 = vld [vmem:[%s7707_s1 + $0x244] ss:$16 sps:$4 sm:$0xff]   ;;  %v5028_v23 = vld [vmem:[%s7707_s1 + $0x240] ss:$16 sps:$4 sm:$0xff]  }
   0xd   :  { %1290 = vmatprep.subr.bf16.mxu1 %v5013_v13  ;;  %v5029_v24 = vld [vmem:[%s7707_s1 + $0x24] ss:$16 sps:$4 sm:$0xff]   ;;  %v5033_v26 = vld [vmem:[%s7707_s1 + $0x20] ss:$16 sps:$4 sm:$0xff]   ;;  %v5100_v13 = vld [vmem:[%s7707_s1 + $0xec] ss:$16 sps:$4 sm:$0xff]  }
   0xe   :  { %v5031_v25 = vld [vmem:[%s7707_s1 + $0x224] ss:$16 sps:$4 sm:$0xff]   ;;  %v5034_v27 = vld [vmem:[%s7707_s1 + $0x220] ss:$16 sps:$4 sm:$0xff]  }
   0xf   :  { %1250 = vmatpush1.bf16.msra.mxu0 %v5015_v14  ;;  %v5035_v28 = vld [vmem:[%s7707_s1 + $0x4] ss:$16 sps:$4 sm:$0xff]   ;;  %v5039_v30 = vld [vmem:[%s7707_s1] ss:$16 sps:$4 sm:$0xff]  }
  0x10   :  { %1291 = vmatpush1.bf16.msra.mxu1 %v5016_v15  ;;  %1251 = vmatprep.subr.bf16.mxu0 %v5017_v16  ;;  %v5037_v29 = vld [vmem:[%s7707_s1 + $0x204] ss:$16 sps:$4 sm:$0xff]   ;;  %v5040_v31 = vld [vmem:[%s7707_s1 + $0x200] ss:$16 sps:$4 sm:$0xff]   ;;  %v5838_v16 = vmov 0  }
  0x11   :  { %1292 = vmatprep.subr.bf16.mxu1 %v5019_v17  ;;  %v5041_v32 = vld [vmem:[%s7707_s1 + $0x1e4] ss:$16 sps:$4 sm:$0xff]   ;;  %v5045_v34 = vld [vmem:[%s7707_s1 + $0x1e0] ss:$16 sps:$4 sm:$0xff]  }
  0x12   :  { %v5043_v33 = vld [vmem:[%s7707_s1 + $0x3e4] ss:$16 sps:$4 sm:$0xff]   ;;  %v5046_v35 = vld [vmem:[%s7707_s1 + $0x3e0] ss:$16 sps:$4 sm:$0xff]  }
  0x13   :  { %1252 = vmatpush1.bf16.msra.mxu0 %v5021_v18  ;;  %v5047_v36 = vld [vmem:[%s7707_s1 + $0x1c4] ss:$16 sps:$4 sm:$0xff]   ;;  %v5051_v38 = vld [vmem:[%s7707_s1 + $0x1c0] ss:$16 sps:$4 sm:$0xff]   ;;  %v5098_v18 = vld [vmem:[%s7707_s1 + $0xe8] ss:$16 sps:$4 sm:$0xff]  }
  0x14   :  { %1293 = vmatpush1.bf16.msra.mxu1 %v5022_v19  ;;  %1253 = vmatprep.subr.bf16.mxu0 %v5023_v20  ;;  %v5049_v37 = vld [vmem:[%s7707_s1 + $0x3c4] ss:$16 sps:$4 sm:$0xff]   ;;  %v5052_v39 = vld [vmem:[%s7707_s1 + $0x3c0] ss:$16 sps:$4 sm:$0xff]  }
  0x15   :  { %1294 = vmatprep.subr.bf16.mxu1 %v5025_v21  ;;  %v5053_v40 = vld [vmem:[%s7707_s1 + $0x1a4] ss:$16 sps:$4 sm:$0xff]   ;;  %v5057_v42 = vld [vmem:[%s7707_s1 + $0x1a0] ss:$16 sps:$4 sm:$0xff]   ;;  %v5106_v21 = vld [vmem:[%s7707_s1 + $0xcc] ss:$16 sps:$4 sm:$0xff]  }
  0x16   :  { %v5055_v41 = vld [vmem:[%s7707_s1 + $0x3a4] ss:$16 sps:$4 sm:$0xff]   ;;  %v5058_v43 = vld [vmem:[%s7707_s1 + $0x3a0] ss:$16 sps:$4 sm:$0xff]  }
  0x17   :  { %1254 = vmatpush1.bf16.msra.mxu0 %v5027_v22  ;;  %v5059_v44 = vld [vmem:[%s7707_s1 + $0x184] ss:$16 sps:$4 sm:$0xff]   ;;  %v5063_v47 = vld [vmem:[%s7707_s1 + $0x180] ss:$16 sps:$4 sm:$0xff]  }
  0x18   :  { %1295 = vmatpush1.bf16.msra.mxu1 %v5028_v23  ;;  %1255 = vmatprep.subr.bf16.mxu0 %v5029_v24  ;;  %v5061_v45 = vld [vmem:[%s7707_s1 + $0x384] ss:$16 sps:$4 sm:$0xff]   ;;  %v5064_v48 = vld [vmem:[%s7707_s1 + $0x380] ss:$16 sps:$4 sm:$0xff]   ;;  %v5104_v23 = vld [vmem:[%s7707_s1 + $0xc8] ss:$16 sps:$4 sm:$0xff]  }
  0x19   :  { %1296 = vmatprep.subr.bf16.mxu1 %v5031_v25  ;;  %v5065_v51 = vld [vmem:[%s7707_s1 + $0x164] ss:$16 sps:$4 sm:$0xff]   ;;  %v5069_v54 = vld [vmem:[%s7707_s1 + $0x160] ss:$16 sps:$4 sm:$0xff]   ;;  %v5112_v25 = vld [vmem:[%s7707_s1 + $0xac] ss:$16 sps:$4 sm:$0xff]  }
  0x1a   :  { %v5067_v53 = vld [vmem:[%s7707_s1 + $0x364] ss:$16 sps:$4 sm:$0xff]   ;;  %v5070_v55 = vld [vmem:[%s7707_s1 + $0x360] ss:$16 sps:$4 sm:$0xff]  }
  0x1b   :  { %1256 = vmatpush1.bf16.msra.mxu0 %v5033_v26  ;;  %v5071_v56 = vld [vmem:[%s7707_s1 + $0x144] ss:$16 sps:$4 sm:$0xff]   ;;  %v5075_v58 = vld [vmem:[%s7707_s1 + $0x140] ss:$16 sps:$4 sm:$0xff]  }
  0x1c   :  { %1297 = vmatpush1.bf16.msra.mxu1 %v5034_v27  ;;  %1257 = vmatprep.subr.bf16.mxu0 %v5035_v28  ;;  %v5073_v57 = vld [vmem:[%s7707_s1 + $0x344] ss:$16 sps:$4 sm:$0xff]   ;;  %v5076_v59 = vld [vmem:[%s7707_s1 + $0x340] ss:$16 sps:$4 sm:$0xff]   ;;  %v5110_v27 = vld [vmem:[%s7707_s1 + $0xa8] ss:$16 sps:$4 sm:$0xff]  }
  0x1d   :  { %1298 = vmatprep.subr.bf16.mxu1 %v5037_v29  ;;  %v5077_v60 = vld [vmem:[%s7707_s1 + $0x124] ss:$16 sps:$4 sm:$0xff]   ;;  %v5081_v62 = vld [vmem:[%s7707_s1 + $0x120] ss:$16 sps:$4 sm:$0xff]   ;;  %v5118_v29 = vld [vmem:[%s7707_s1 + $0x8c] ss:$16 sps:$4 sm:$0xff]  }
  0x1e   :  { %v5079_v61 = vld [vmem:[%s7707_s1 + $0x324] ss:$16 sps:$4 sm:$0xff]   ;;  %v5082_v63 = vld [vmem:[%s7707_s1 + $0x320] ss:$16 sps:$4 sm:$0xff]  }
  0x1f   :  { %1258 = vmatpush1.bf16.msra.mxu0 %v5039_v30  ;;  %v5083_v0 = vld [vmem:[%s7707_s1 + $0x104] ss:$16 sps:$4 sm:$0xff]   ;;  %v5087_v2 = vld [vmem:[%s7707_s1 + $0x100] ss:$16 sps:$4 sm:$0xff]  }
  0x20   :  { %1299 = vmatpush1.bf16.msra.mxu1 %v5040_v31  ;;  %1259 = vmatprep.subr.bf16.mxu0 %v5041_v32  ;;  %v5085_v1 = vld [vmem:[%s7707_s1 + $0x304] ss:$16 sps:$4 sm:$0xff]   ;;  %v5088_v3 = vld [vmem:[%s7707_s1 + $0x300] ss:$16 sps:$4 sm:$0xff]   ;;  %v5116_v31 = vld [vmem:[%s7707_s1 + $0x88] ss:$16 sps:$4 sm:$0xff]  }
  0x21   :  { %1300 = vmatprep.subr.bf16.mxu1 %v5043_v33  ;;  %v27_v4 = vld [vmem:[%s7708_s0] sm:$0xff]  ;;  %v29_v5 = vld [vmem:[%s7708_s0 + $0x10] sm:$0xff]  ;;  %v5124_v33 = vld [vmem:[%s7707_s1 + $0x6c] ss:$16 sps:$4 sm:$0xff]  }
  0x22   :  { %v5091_v6 = vld [vmem:[%s7707_s1 + $0x4e4] ss:$16 sps:$4 sm:$0xff]   ;;  %v6095_v8 = vpack.c.bf16 %v27_v4, %v27_v4  ;;  %v6097_v9 = vpack.c.bf16 %v29_v5, %v29_v5  ;;  %v5089_v10 = vld [vmem:[%s7707_s1 + $0x4e0] ss:$16 sps:$4 sm:$0xff]   ;;  %v5172_v4 = vld [vmem:[%s7707_s1 + $0x16c] ss:$16 sps:$4 sm:$0xff]  }
  0x23   :  { %1260 = vmatpush2.bf16.msra.mxu0 %v5045_v34  ;;  %v5094_v7 = vld [vmem:[%s7707_s1 + $0x604] ss:$16 sps:$4 sm:$0xff]   ;;  %v5092_v11 = vld [vmem:[%s7707_s1 + $0x600] ss:$16 sps:$4 sm:$0xff]  }
  0x24   :  { %1301 = vmatpush2.bf16.msra.mxu1 %v5046_v35  ;;  %1261 = vmatprep.subr.bf16.mxu0 %v5047_v36  ;;  %v5097_v12 = vld [vmem:[%s7707_s1 + $0x4c4] ss:$16 sps:$4 sm:$0xff]   ;;  %v5095_v14 = vld [vmem:[%s7707_s1 + $0x4c0] ss:$16 sps:$4 sm:$0xff]   ;;  %v32_v35 = vld [vmem:[%s7708_s0 + $0x28] sm:$0xff] }
  0x25   :  { %1302 = vmatprep.subr.bf16.mxu1 %v5049_v37  ;;  %v33_v15 = vld [vmem:[%s7708_s0 + $0x30] sm:$0xff]  ;;  %v6179_v36 = vpack.c.bf16 %v32_v35, %v32_v35  ;;  %v5122_v37 = vld [vmem:[%s7707_s1 + $0x68] ss:$16 sps:$4 sm:$0xff]  }
  0x26   :  { %v5103_v17 = vld [vmem:[%s7707_s1 + $0x4a4] ss:$16 sps:$4 sm:$0xff]   ;;  %v6126_v19 = vpack.c.bf16 %v33_v15, %v33_v15  ;;  %v5101_v20 = vld [vmem:[%s7707_s1 + $0x4a0] ss:$16 sps:$4 sm:$0xff]   ;;  %v5209_v35 = vld [vmem:[%s7707_s1 + $0x268] ss:$16 sps:$4 sm:$0xff]  }
  0x27   :  { %1262 = vmatpush2.bf16.msra.mxu0 %v5051_v38  ;;  %v5109_v22 = vld [vmem:[%s7707_s1 + $0x484] ss:$16 sps:$4 sm:$0xff]   ;;  %v5107_v24 = vld [vmem:[%s7707_s1 + $0x480] ss:$16 sps:$4 sm:$0xff]  }
  0x28   :  { %1303 = vmatpush2.bf16.msra.mxu1 %v5052_v39  ;;  %1263 = vmatprep.subr.bf16.mxu0 %v5053_v40  ;;  %v5115_v26 = vld [vmem:[%s7707_s1 + $0x464] ss:$16 sps:$4 sm:$0xff]   ;;  %v5113_v28 = vld [vmem:[%s7707_s1 + $0x460] ss:$16 sps:$4 sm:$0xff]   ;;  %v5130_v39 = vld [vmem:[%s7707_s1 + $0x4c] ss:$16 sps:$4 sm:$0xff]  }
  0x29   :  { %1304 = vmatprep.subr.bf16.mxu1 %v5055_v41  ;;  %v5121_v30 = vld [vmem:[%s7707_s1 + $0x444] ss:$16 sps:$4 sm:$0xff]   ;;  %v5119_v32 = vld [vmem:[%s7707_s1 + $0x440] ss:$16 sps:$4 sm:$0xff]   ;;  %v5128_v41 = vld [vmem:[%s7707_s1 + $0x48] ss:$16 sps:$4 sm:$0xff]  }
  0x2a   :  { %v5127_v34 = vld [vmem:[%s7707_s1 + $0x424] ss:$16 sps:$4 sm:$0xff]   ;;  %v5125_v38 = vld [vmem:[%s7707_s1 + $0x420] ss:$16 sps:$4 sm:$0xff]  }
  0x2b   :  { %1264 = vmatpush2.bf16.msra.mxu0 %v5057_v42  ;;  %v5133_v40 = vld [vmem:[%s7707_s1 + $0x404] ss:$16 sps:$4 sm:$0xff]   ;;  %v5131_v42 = vld [vmem:[%s7707_s1 + $0x400] ss:$16 sps:$4 sm:$0xff]  }
  0x2c   :  { %1305 = vmatpush2.bf16.msra.mxu1 %v5058_v43  ;;  %1265 = vmatprep.subr.bf16.mxu0 %v5059_v44  ;;  %v5136_v43 = vld [vmem:[%s7707_s1 + $0x2c] ss:$16 sps:$4 sm:$0xff]   ;;  %v5139_v44 = vld [vmem:[%s7707_s1 + $0x5e4] ss:$16 sps:$4 sm:$0xff]   ;;  %v5137_v46 = vld [vmem:[%s7707_s1 + $0x5e0] ss:$16 sps:$4 sm:$0xff]  }
  0x2d   :  { %1306 = vmatprep.subr.bf16.mxu1 %v5061_v45  ;;  %v5134_v45 = vld [vmem:[%s7707_s1 + $0x28] ss:$16 sps:$4 sm:$0xff]   ;;  %v5143_v50 = vld [vmem:[%s7707_s1 + $0x5c0] ss:$16 sps:$4 sm:$0xff]   ;;  %v5175_v5 = vld [vmem:[%s7707_s1 + $0x524] ss:$16 sps:$4 sm:$0xff]  }
  0x2e   :  { %v31_v15 = vld [vmem:[%s7708_s0 + $0x20] sm:$0xff] }
  0x2f   :  { %1266 = vmatpush2.bf16.msra.mxu0 %v5063_v47  ;;  %v5142_v47 = vld [vmem:[%s7707_s1 + $0xc] ss:$16 sps:$4 sm:$0xff]  }
  0x30   :  { %1307 = vmatpush2.bf16.msra.mxu1 %v5064_v48  ;;  %1267 = vmatprep.subr.bf16.mxu0 %v5065_v51  ;;  %v5145_v48 = vld [vmem:[%s7707_s1 + $0x5c4] ss:$16 sps:$4 sm:$0xff]   ;;  %v5148_v51 = vld [vmem:[%s7707_s1 + $0x1ec] ss:$16 sps:$4 sm:$0xff]  }
  0x31   :  { %1308 = vmatprep.subr.bf16.mxu1 %v5067_v53  ;;  %v5151_v53 = vld [vmem:[%s7707_s1 + $0x5a4] ss:$16 sps:$4 sm:$0xff]  }
  0x33   :  { %1268 = vmatpush2.bf16.msra.mxu0 %v5069_v54  ;;  %v5146_v54 = vld [vmem:[%s7707_s1 + $0x1e8] ss:$16 sps:$4 sm:$0xff]  }
  0x34   :  { %1309 = vmatpush2.bf16.msra.mxu1 %v5070_v55  ;;  %1269 = vmatprep.subr.bf16.mxu0 %v5071_v56  ;;  %v5149_v55 = vld [vmem:[%s7707_s1 + $0x5a0] ss:$16 sps:$4 sm:$0xff]   ;;  %v5154_v56 = vld [vmem:[%s7707_s1 + $0x1cc] ss:$16 sps:$4 sm:$0xff]  }
  0x35   :  { %1310 = vmatprep.subr.bf16.mxu1 %v5073_v57  ;;  %v5157_v57 = vld [vmem:[%s7707_s1 + $0x584] ss:$16 sps:$4 sm:$0xff]  }
  0x37   :  { %1270 = vmatpush2.bf16.msra.mxu0 %v5075_v58  ;;  %v5152_v58 = vld [vmem:[%s7707_s1 + $0x1c8] ss:$16 sps:$4 sm:$0xff]  }
  0x38   :  { %1311 = vmatpush2.bf16.msra.mxu1 %v5076_v59  ;;  %1271 = vmatprep.subr.bf16.mxu0 %v5077_v60  ;;  %v5155_v59 = vld [vmem:[%s7707_s1 + $0x580] ss:$16 sps:$4 sm:$0xff]   ;;  %v5160_v60 = vld [vmem:[%s7707_s1 + $0x1ac] ss:$16 sps:$4 sm:$0xff]  }
  0x39   :  { %1312 = vmatprep.subr.bf16.mxu1 %v5079_v61  ;;  %v5163_v61 = vld [vmem:[%s7707_s1 + $0x564] ss:$16 sps:$4 sm:$0xff]  }
  0x3b   :  { %1272 = vmatpush2.bf16.msra.mxu0 %v5081_v62  ;;  %v5158_v62 = vld [vmem:[%s7707_s1 + $0x1a8] ss:$16 sps:$4 sm:$0xff]  }
  0x3c   :  { %1313 = vmatpush2.bf16.msra.mxu1 %v5082_v63  ;;  %1273 = vmatprep.subr.bf16.mxu0 %v5083_v0  ;;  %v5161_v63 = vld [vmem:[%s7707_s1 + $0x560] ss:$16 sps:$4 sm:$0xff]   ;;  %v5166_v0 = vld [vmem:[%s7707_s1 + $0x18c] ss:$16 sps:$4 sm:$0xff]  }
  0x3d   :  { %1314 = vmatprep.subr.bf16.mxu1 %v5085_v1  ;;  %v5169_v1 = vld [vmem:[%s7707_s1 + $0x544] ss:$16 sps:$4 sm:$0xff]  }
  0x3f   :  { %1274 = vmatpush2.bf16.msra.mxu0 %v5087_v2  ;;  %v5164_v2 = vld [vmem:[%s7707_s1 + $0x188] ss:$16 sps:$4 sm:$0xff]  }
  0x40   :  { %1315 = vmatpush2.bf16.msra.mxu1 %v5088_v3  ;;  %1325 = vmatprep.subr.bf16.mxu0 %v5091_v6  ;;  %v5167_v3 = vld [vmem:[%s7707_s1 + $0x540] ss:$16 sps:$4 sm:$0xff]   ;;  %v5170_v6 = vld [vmem:[%s7707_s1 + $0x168] ss:$16 sps:$4 sm:$0xff]  }
  0x41   :  { %1380 = vmatprep.subr.bf16.mxu1 %v5094_v7  ;;  %v5173_v7 = vld [vmem:[%s7707_s1 + $0x520] ss:$16 sps:$4 sm:$0xff]  }
  0x42   :  { %1276 = vmatmul.mubr.bf16.vlgmr.msra.gmra.mxu0 %v6095_v8 }
  0x43   :  { %1317 = vmatmul.mubr.bf16.vlgmr.msra.gmra.mxu1 %v6097_v9  ;;  %1326 = vmatpush1.bf16.msra.mxu0 %v5089_v10  ;;  %v5178_v10 = vld [vmem:[%s7707_s1 + $0x14c] ss:$16 sps:$4 sm:$0xff]  }
  0x44   :  { %1381 = vmatpush1.bf16.msra.mxu1 %v5092_v11  ;;  %1327 = vmatprep.subr.bf16.mxu0 %v5097_v12  ;;  %v5181_v11 = vld [vmem:[%s7707_s1 + $0x504] ss:$16 sps:$4 sm:$0xff]   ;;  %v5176_v12 = vld [vmem:[%s7707_s1 + $0x148] ss:$16 sps:$4 sm:$0xff]  }
  0x45   :  { %1398 = vmatprep.mubr.bf16.mxu1 %v5838_v16  ;;  %1407 = vmatprep.subr.bf16.mxu1 %v5100_v13  ;;  %v5179_v13 = vld [vmem:[%s7707_s1 + $0x500] ss:$16 sps:$4 sm:$0xff]  }
  0x46   :  { %1357 = vmatprep.mubr.bf16.mxu0 %v6179_v36 }
  0x47   :  { %1328 = vmatpush1.bf16.msra.mxu0 %v5095_v14  ;;  %v5184_v14 = vld [vmem:[%s7707_s1 + $0x12c] ss:$16 sps:$4 sm:$0xff]  }
  0x48   :  { %1329 = vmatprep.subr.bf16.mxu0 %v5103_v17  ;;  %v5187_v17 = vld [vmem:[%s7707_s1 + $0x2ec] ss:$16 sps:$4 sm:$0xff]  }
  0x4b   :  { %4586 = vmatmul.mubr.msk.bf16.vlgmr.msra.gmra.mxu1 %vm1239_vm0, %v6126_v19  ;;  %1330 = vmatpush1.bf16.msra.mxu0 %v5101_v20  ;;  %v6308_v20 = vpack.c.bf16 %v31_v15, %v31_v15  ;;  %v5274_v15 = vld [vmem:[%s7707_s1 + $0x54c] ss:$16 sps:$4 sm:$0xff]  }
  0x4c   :  { %1408 = vmatpush1.bf16.msra.mxu1 %v5098_v18  ;;  %1331 = vmatprep.subr.bf16.mxu0 %v5109_v22  ;;  %v5182_v18 = vld [vmem:[%s7707_s1 + $0x128] ss:$16 sps:$4 sm:$0xff]   ;;  %v5190_v22 = vld [vmem:[%s7707_s1 + $0x10c] ss:$16 sps:$4 sm:$0xff]  }
  0x4d   :  { %1409 = vmatprep.subr.bf16.mxu1 %v5106_v21  ;;  %1439 = vmatprep.mubr.bf16.mxu1 %v6026_v49  ;;  %v5140_v49 = vld [vmem:[%s7707_s1 + $0x8] ss:$16 sps:$4 sm:$0xff]  }
  0x4e   :  { %v5185_v21 = vld [vmem:[%s7707_s1 + $0x2e8] ss:$16 sps:$4 sm:$0xff]  }
  0x4f   :  { %1332 = vmatpush1.bf16.msra.mxu0 %v5107_v24  ;;  %v5188_v24 = vld [vmem:[%s7707_s1 + $0x108] ss:$16 sps:$4 sm:$0xff]  }
  0x50   :  { %1410 = vmatpush1.bf16.msra.mxu1 %v5104_v23  ;;  %1333 = vmatprep.subr.bf16.mxu0 %v5115_v26  ;;  %v5193_v23 = vld [vmem:[%s7707_s1 + $0x2cc] ss:$16 sps:$4 sm:$0xff]  }
  0x51   :  { %1411 = vmatprep.subr.bf16.mxu1 %v5112_v25  ;;  %v5191_v25 = vld [vmem:[%s7707_s1 + $0x2c8] ss:$16 sps:$4 sm:$0xff]   ;;  %v5196_v26 = vld [vmem:[%s7707_s1 + $0x4ec] ss:$16 sps:$4 sm:$0xff]  }
  0x53   :  { %1334 = vmatpush1.bf16.msra.mxu0 %v5113_v28  ;;  %v5194_v28 = vld [vmem:[%s7707_s1 + $0x4e8] ss:$16 sps:$4 sm:$0xff]  }
  0x54   :  { %1412 = vmatpush1.bf16.msra.mxu1 %v5110_v27  ;;  %1335 = vmatprep.subr.bf16.mxu0 %v5121_v30  ;;  %v5199_v27 = vld [vmem:[%s7707_s1 + $0x2ac] ss:$16 sps:$4 sm:$0xff]  }
  0x55   :  { %1413 = vmatprep.subr.bf16.mxu1 %v5118_v29  ;;  %v5197_v29 = vld [vmem:[%s7707_s1 + $0x2a8] ss:$16 sps:$4 sm:$0xff]   ;;  %v5202_v30 = vld [vmem:[%s7707_s1 + $0x4cc] ss:$16 sps:$4 sm:$0xff]  }
  0x57   :  { %1336 = vmatpush1.bf16.msra.mxu0 %v5119_v32  ;;  %v5203_v32 = vld [vmem:[%s7707_s1 + $0x288] ss:$16 sps:$4 sm:$0xff]  }
  0x58   :  { %1414 = vmatpush1.bf16.msra.mxu1 %v5116_v31  ;;  %1337 = vmatprep.subr.bf16.mxu0 %v5127_v34  ;;  %v5200_v31 = vld [vmem:[%s7707_s1 + $0x4c8] ss:$16 sps:$4 sm:$0xff]  }
  0x59   :  { %1415 = vmatprep.subr.bf16.mxu1 %v5124_v33  ;;  %v5208_v33 = vld [vmem:[%s7707_s1 + $0x4ac] ss:$16 sps:$4 sm:$0xff]   ;;  %v5206_v34 = vld [vmem:[%s7707_s1 + $0x4a8] ss:$16 sps:$4 sm:$0xff]  }
  0x5b   :  { %1338 = vmatpush1.bf16.msra.mxu0 %v5125_v38  ;;  %v5212_v38 = vld [vmem:[%s7707_s1 + $0x488] ss:$16 sps:$4 sm:$0xff]  }
  0x5c   :  { %1416 = vmatpush1.bf16.msra.mxu1 %v5122_v37  ;;  %1339 = vmatprep.subr.bf16.mxu0 %v5133_v40  ;;  %v5214_v37 = vld [vmem:[%s7707_s1 + $0x48c] ss:$16 sps:$4 sm:$0xff]  }
  0x5d   :  { %1417 = vmatprep.subr.bf16.mxu1 %v5130_v39  ;;  %v5215_v39 = vld [vmem:[%s7707_s1 + $0x248] ss:$16 sps:$4 sm:$0xff]   ;;  %v5220_v40 = vld [vmem:[%s7707_s1 + $0x46c] ss:$16 sps:$4 sm:$0xff]  }
  0x5f   :  { %1340 = vmatpush1.bf16.msra.mxu0 %v5131_v42  ;;  %v5218_v42 = vld [vmem:[%s7707_s1 + $0x468] ss:$16 sps:$4 sm:$0xff]  }
  0x60   :  { %1418 = vmatpush1.bf16.msra.mxu1 %v5128_v41  ;;  %1341 = vmatprep.subr.bf16.mxu0 %v5139_v44  ;;  %v5223_v41 = vld [vmem:[%s7707_s1 + $0x22c] ss:$16 sps:$4 sm:$0xff]  }
  0x61   :  { %1419 = vmatprep.subr.bf16.mxu1 %v5136_v43  ;;  %v5221_v43 = vld [vmem:[%s7707_s1 + $0x228] ss:$16 sps:$4 sm:$0xff]   ;;  %v5226_v44 = vld [vmem:[%s7707_s1 + $0x44c] ss:$16 sps:$4 sm:$0xff]  }
  0x63   :  { %1342 = vmatpush2.bf16.msra.mxu0 %v5137_v46  ;;  %v5224_v46 = vld [vmem:[%s7707_s1 + $0x448] ss:$16 sps:$4 sm:$0xff]  }
  0x64   :  { %1420 = vmatpush1.bf16.msra.mxu1 %v5134_v45  ;;  %1343 = vmatprep.subr.bf16.mxu0 %v5145_v48  ;;  %v5229_v45 = vld [vmem:[%s7707_s1 + $0x20c] ss:$16 sps:$4 sm:$0xff]  }
  0x65   :  { %1421 = vmatprep.subr.bf16.mxu1 %v5142_v47  ;;  %v5227_v47 = vld [vmem:[%s7707_s1 + $0x208] ss:$16 sps:$4 sm:$0xff]   ;;  %v5232_v48 = vld [vmem:[%s7707_s1 + $0x42c] ss:$16 sps:$4 sm:$0xff]  }
  0x67   :  { %1344 = vmatpush2.bf16.msra.mxu0 %v5143_v50  ;;  %v5230_v50 = vld [vmem:[%s7707_s1 + $0x428] ss:$16 sps:$4 sm:$0xff]  }
  0x68   :  { %1422 = vmatpush1.bf16.msra.mxu1 %v5140_v49  ;;  %1345 = vmatprep.subr.bf16.mxu0 %v5151_v53  ;;  %v5235_v49 = vld [vmem:[%s7707_s1 + $0x3ec] ss:$16 sps:$4 sm:$0xff]  }
  0x69   :  { %1423 = vmatprep.subr.bf16.mxu1 %v5148_v51  ;;  %v5233_v51 = vld [vmem:[%s7707_s1 + $0x3e8] ss:$16 sps:$4 sm:$0xff]   ;;  %v5238_v53 = vld [vmem:[%s7707_s1 + $0x40c] ss:$16 sps:$4 sm:$0xff]  }
  0x6b   :  { %1346 = vmatpush2.bf16.msra.mxu0 %v5149_v55  ;;  %v5236_v55 = vld [vmem:[%s7707_s1 + $0x408] ss:$16 sps:$4 sm:$0xff]  }
  0x6c   :  { %1424 = vmatpush2.bf16.msra.mxu1 %v5146_v54  ;;  %1347 = vmatprep.subr.bf16.mxu0 %v5157_v57  ;;  %v5241_v54 = vld [vmem:[%s7707_s1 + $0x3cc] ss:$16 sps:$4 sm:$0xff]  }
  0x6d   :  { %1425 = vmatprep.subr.bf16.mxu1 %v5154_v56  ;;  %v5239_v56 = vld [vmem:[%s7707_s1 + $0x3c8] ss:$16 sps:$4 sm:$0xff]   ;;  %v5244_v57 = vld [vmem:[%s7707_s1 + $0x5ec] ss:$16 sps:$4 sm:$0xff]  }
  0x6f   :  { %1348 = vmatpush2.bf16.msra.mxu0 %v5155_v59  ;;  %v5242_v59 = vld [vmem:[%s7707_s1 + $0x5e8] ss:$16 sps:$4 sm:$0xff]  }
  0x70   :  { %1426 = vmatpush2.bf16.msra.mxu1 %v5152_v58  ;;  %1349 = vmatprep.subr.bf16.mxu0 %v5163_v61  ;;  %v5247_v58 = vld [vmem:[%s7707_s1 + $0x3ac] ss:$16 sps:$4 sm:$0xff]  }
  0x71   :  { %1427 = vmatprep.subr.bf16.mxu1 %v5160_v60  ;;  %v5245_v60 = vld [vmem:[%s7707_s1 + $0x3a8] ss:$16 sps:$4 sm:$0xff]   ;;  %v5250_v61 = vld [vmem:[%s7707_s1 + $0x5cc] ss:$16 sps:$4 sm:$0xff]  }
  0x73   :  { %1350 = vmatpush2.bf16.msra.mxu0 %v5161_v63  ;;  %v5248_v63 = vld [vmem:[%s7707_s1 + $0x5c8] ss:$16 sps:$4 sm:$0xff]  }
  0x74   :  { %1428 = vmatpush2.bf16.msra.mxu1 %v5158_v62  ;;  %1351 = vmatprep.subr.bf16.mxu0 %v5169_v1  ;;  %v5253_v62 = vld [vmem:[%s7707_s1 + $0x38c] ss:$16 sps:$4 sm:$0xff]  }
  0x75   :  { %1429 = vmatprep.subr.bf16.mxu1 %v5166_v0  ;;  %v5251_v0 = vld [vmem:[%s7707_s1 + $0x388] ss:$16 sps:$4 sm:$0xff]   ;;  %v5256_v1 = vld [vmem:[%s7707_s1 + $0x5ac] ss:$16 sps:$4 sm:$0xff]  }
  0x77   :  { %1352 = vmatpush2.bf16.msra.mxu0 %v5167_v3  ;;  %v5254_v3 = vld [vmem:[%s7707_s1 + $0x5a8] ss:$16 sps:$4 sm:$0xff]  }
  0x78   :  { %1430 = vmatpush2.bf16.msra.mxu1 %v5164_v2  ;;  %1353 = vmatprep.subr.bf16.mxu0 %v5175_v5  ;;  %v5259_v2 = vld [vmem:[%s7707_s1 + $0x36c] ss:$16 sps:$4 sm:$0xff]  }
  0x79   :  { %1431 = vmatprep.subr.bf16.mxu1 %v5172_v4  ;;  %v5257_v4 = vld [vmem:[%s7707_s1 + $0x368] ss:$16 sps:$4 sm:$0xff]   ;;  %v5262_v5 = vld [vmem:[%s7707_s1 + $0x58c] ss:$16 sps:$4 sm:$0xff]  }
  0x7b   :  { %1354 = vmatpush2.bf16.msra.mxu0 %v5173_v7  ;;  %v5260_v7 = vld [vmem:[%s7707_s1 + $0x588] ss:$16 sps:$4 sm:$0xff]  }
  0x7c   :  { %1432 = vmatpush2.bf16.msra.mxu1 %v5170_v6  ;;  %1355 = vmatprep.subr.bf16.mxu0 %v5181_v11  ;;  %v5265_v6 = vld [vmem:[%s7707_s1 + $0x34c] ss:$16 sps:$4 sm:$0xff]  }
  0x7d   :  { %1433 = vmatprep.subr.bf16.mxu1 %v5178_v10  ;;  %v5263_v10 = vld [vmem:[%s7707_s1 + $0x348] ss:$16 sps:$4 sm:$0xff]   ;;  %v5268_v11 = vld [vmem:[%s7707_s1 + $0x56c] ss:$16 sps:$4 sm:$0xff]  }
  0x7f   :  { %1356 = vmatpush2.bf16.msra.mxu0 %v5179_v13  ;;  %v5266_v13 = vld [vmem:[%s7707_s1 + $0x568] ss:$16 sps:$4 sm:$0xff]  }
  0x80   :  { %1434 = vmatpush2.bf16.msra.mxu1 %v5176_v12  ;;  %1448 = vmatprep.subr.bf16.mxu0 %v5187_v17  ;;  %v5271_v12 = vld [vmem:[%s7707_s1 + $0x32c] ss:$16 sps:$4 sm:$0xff]  }
  0x81   :  { %1435 = vmatprep.subr.bf16.mxu1 %v5184_v14  ;;  %v5269_v14 = vld [vmem:[%s7707_s1 + $0x328] ss:$16 sps:$4 sm:$0xff]   ;;  %v5277_v17 = vld [vmem:[%s7707_s1 + $0x30c] ss:$16 sps:$4 sm:$0xff]  }
  0x82   :  { %1358 = vmatmul.mubr.bf16.vlgmr.msra.gmra.mxu0 %v6308_v20 }
  0x83   :  { %1449 = vmatpush1.bf16.msra.mxu0 %v5185_v21  ;;  %1480 = vmatprep.mubr.bf16.mxu0 %v6034_v52  ;;  %v5205_v52 = vld [vmem:[%s7707_s1 + $0x28c] ss:$16 sps:$4 sm:$0xff]   ;;  %v5275_v21 = vld [vmem:[%s7707_s1 + $0x308] ss:$16 sps:$4 sm:$0xff]  }
  0x84   :  { %1436 = vmatpush2.bf16.msra.mxu1 %v5182_v18  ;;  %1450 = vmatprep.subr.bf16.mxu0 %v5193_v23  ;;  %v5272_v18 = vld [vmem:[%s7707_s1 + $0x548] ss:$16 sps:$4 sm:$0xff]   ;;  %v5283_v23 = vld [vmem:[%s7707_s1 + $0x60c] ss:$16 sps:$4 sm:$0xff]  }
  0x85   :  { %1437 = vmatprep.subr.bf16.mxu1 %v5190_v22  ;;  %v5280_v22 = vld [vmem:[%s7707_s1 + $0x52c] ss:$16 sps:$4 sm:$0xff]  }
  0x87   :  { %1451 = vmatpush1.bf16.msra.mxu0 %v5191_v25  ;;  %v5281_v25 = vld [vmem:[%s7707_s1 + $0x608] ss:$16 sps:$4 sm:$0xff]  }
  0x88   :  { %1438 = vmatpush2.bf16.msra.mxu1 %v5188_v24  ;;  %1452 = vmatprep.subr.bf16.mxu0 %v5199_v27  ;;  %v5278_v24 = vld [vmem:[%s7707_s1 + $0x528] ss:$16 sps:$4 sm:$0xff]   ;;  %v5289_v27 = vld [vmem:[%s7709_s3 + $0xe4] ss:$16 sps:$4 sm:$0xff]  }
  0x89   :  { %1489 = vmatprep.subr.bf16.mxu1 %v5196_v26  ;;  %v5286_v26 = vld [vmem:[%s7707_s1 + $0x50c] ss:$16 sps:$4 sm:$0xff]  }
  0x8b   :  { %1440 = vmatmul.mubr.bf16.vlgmr.msra.gmra.mxu1 %v6095_v8  ;;  %1453 = vmatpush1.bf16.msra.mxu0 %v5197_v29  ;;  %v5211_v8 = vld [vmem:[%s7707_s1 + $0x26c] ss:$16 sps:$4 sm:$0xff]   ;;  %v5287_v29 = vld [vmem:[%s7709_s3 + $0xe0] ss:$16 sps:$4 sm:$0xff]  }
  0x8c   :  { %1490 = vmatpush1.bf16.msra.mxu1 %v5194_v28  ;;  %1454 = vmatprep.subr.bf16.mxu0 %v5205_v52  ;;  %v5284_v28 = vld [vmem:[%s7707_s1 + $0x508] ss:$16 sps:$4 sm:$0xff]   ;;  %v5293_v52 = vld [vmem:[%s7709_s3 + $0xa0] ss:$16 sps:$4 sm:$0xff]  }
  0x8d   :  { %1491 = vmatprep.subr.bf16.mxu1 %v5202_v30  ;;  %1521 = vmatprep.mubr.bf16.mxu1 %v6179_v36  ;;  %v5217_v36 = vld [vmem:[%s7707_s1 + $0x24c] ss:$16 sps:$4 sm:$0xff]   ;;  %v5292_v30 = vld [vmem:[%s7709_s3 + $0xc4] ss:$16 sps:$4 sm:$0xff]  }
  0x8f   :  { %1455 = vmatpush1.bf16.msra.mxu0 %v5203_v32  ;;  %v5299_v32 = vld [vmem:[%s7709_s3 + $0x60] ss:$16 sps:$4 sm:$0xff]  }
  0x90   :  { %1492 = vmatpush1.bf16.msra.mxu1 %v5200_v31  ;;  %1456 = vmatprep.subr.bf16.mxu0 %v5211_v8  ;;  %v5301_v31 = vld [vmem:[%s7709_s3 + $0x64] ss:$16 sps:$4 sm:$0xff]   ;;  %v5302_v8 = vld [vmem:[%s7709_s3 + $0x40] ss:$16 sps:$4 sm:$0xff]  }
  0x91   :  { %1493 = vmatprep.subr.bf16.mxu1 %v5208_v33  ;;  %v5304_v33 = vld [vmem:[%s7709_s3 + $0x44] ss:$16 sps:$4 sm:$0xff]  }
  0x93   :  { %1457 = vmatpush1.bf16.msra.mxu0 %v5209_v35  ;;  %v5305_v35 = vld [vmem:[%s7709_s3 + $0x20] ss:$16 sps:$4 sm:$0xff]  }
  0x94   :  { %1494 = vmatpush1.bf16.msra.mxu1 %v5206_v34  ;;  %1458 = vmatprep.subr.bf16.mxu0 %v5217_v36  ;;  %v5307_v34 = vld [vmem:[%s7709_s3 + $0x24] ss:$16 sps:$4 sm:$0xff]   ;;  %v5308_v36 = vld [vmem:[%s7709_s3] ss:$16 sps:$4 sm:$0xff]  }
  0x95   :  { %1495 = vmatprep.subr.bf16.mxu1 %v5214_v37  ;;  %v5310_v37 = vld [vmem:[%s7709_s3 + $0x4] ss:$16 sps:$4 sm:$0xff]  }
  0x97   :  { %1459 = vmatpush1.bf16.msra.mxu0 %v5215_v39  ;;  %v5311_v39 = vld [vmem:[%s7709_s3 + $0x1e0] ss:$16 sps:$4 sm:$0xff]  }
  0x98   :  { %1496 = vmatpush1.bf16.msra.mxu1 %v5212_v38  ;;  %1460 = vmatprep.subr.bf16.mxu0 %v5223_v41  ;;  %v5313_v38 = vld [vmem:[%s7709_s3 + $0x1e4] ss:$16 sps:$4 sm:$0xff]   ;;  %v5314_v41 = vld [vmem:[%s7709_s3 + $0x1c0] ss:$16 sps:$4 sm:$0xff]  }
  0x99   :  { %1497 = vmatprep.subr.bf16.mxu1 %v5220_v40  ;;  %v5316_v40 = vld [vmem:[%s7709_s3 + $0x1c4] ss:$16 sps:$4 sm:$0xff]  }
  0x9b   :  { %1461 = vmatpush1.bf16.msra.mxu0 %v5221_v43  ;;  %v5317_v43 = vld [vmem:[%s7709_s3 + $0x1a0] ss:$16 sps:$4 sm:$0xff]  }
  0x9c   :  { %1498 = vmatpush1.bf16.msra.mxu1 %v5218_v42  ;;  %1462 = vmatprep.subr.bf16.mxu0 %v5229_v45  ;;  %v5319_v42 = vld [vmem:[%s7709_s3 + $0x1a4] ss:$16 sps:$4 sm:$0xff]   ;;  %v5320_v45 = vld [vmem:[%s7709_s3 + $0x180] ss:$16 sps:$4 sm:$0xff]  }
  0x9d   :  { %1499 = vmatprep.subr.bf16.mxu1 %v5226_v44  ;;  %v5322_v44 = vld [vmem:[%s7709_s3 + $0x184] ss:$16 sps:$4 sm:$0xff]  }
  0x9f   :  { %1463 = vmatpush1.bf16.msra.mxu0 %v5227_v47  ;;  %v5343_v47 = vld [vmem:[%s7709_s3 + $0x2e4] ss:$16 sps:$4 sm:$0xff]  }
  0xa0   :  { %1500 = vmatpush1.bf16.msra.mxu1 %v5224_v46  ;;  %1464 = vmatprep.subr.bf16.mxu0 %v5235_v49  ;;  %v5341_v46 = vld [vmem:[%s7709_s3 + $0x2e0] ss:$16 sps:$4 sm:$0xff]  }
  0xa1   :  { %1501 = vmatprep.subr.bf16.mxu1 %v5232_v48  ;;  %v5325_v48 = vld [vmem:[%s7709_s3 + $0x164] ss:$16 sps:$4 sm:$0xff]   ;;  %v5323_v49 = vld [vmem:[%s7709_s3 + $0x160] ss:$16 sps:$4 sm:$0xff]  }
  0xa3   :  { %1465 = vmatpush2.bf16.msra.mxu0 %v5233_v51  ;;  %v5349_v51 = vld [vmem:[%s7709_s3 + $0x2c4] ss:$16 sps:$4 sm:$0xff]  }
  0xa4   :  { %1502 = vmatpush1.bf16.msra.mxu1 %v5230_v50  ;;  %1466 = vmatprep.subr.bf16.mxu0 %v5241_v54  ;;  %v5347_v50 = vld [vmem:[%s7709_s3 + $0x2c0] ss:$16 sps:$4 sm:$0xff]  }
  0xa5   :  { %1503 = vmatprep.subr.bf16.mxu1 %v5238_v53  ;;  %v5328_v53 = vld [vmem:[%s7709_s3 + $0x144] ss:$16 sps:$4 sm:$0xff]   ;;  %v5326_v54 = vld [vmem:[%s7709_s3 + $0x140] ss:$16 sps:$4 sm:$0xff]  }
  0xa7   :  { %1467 = vmatpush2.bf16.msra.mxu0 %v5239_v56  ;;  %v5355_v56 = vld [vmem:[%s7709_s3 + $0x2a4] ss:$16 sps:$4 sm:$0xff]  }
  0xa8   :  { %1504 = vmatpush1.bf16.msra.mxu1 %v5236_v55  ;;  %1468 = vmatprep.subr.bf16.mxu0 %v5247_v58  ;;  %v5353_v55 = vld [vmem:[%s7709_s3 + $0x2a0] ss:$16 sps:$4 sm:$0xff]  }
  0xa9   :  { %1505 = vmatprep.subr.bf16.mxu1 %v5244_v57  ;;  %v5331_v57 = vld [vmem:[%s7709_s3 + $0x124] ss:$16 sps:$4 sm:$0xff]   ;;  %v5329_v58 = vld [vmem:[%s7709_s3 + $0x120] ss:$16 sps:$4 sm:$0xff]  }
  0xab   :  { %1469 = vmatpush2.bf16.msra.mxu0 %v5245_v60  ;;  %v5361_v60 = vld [vmem:[%s7709_s3 + $0x284] ss:$16 sps:$4 sm:$0xff]  }
  0xac   :  { %1506 = vmatpush2.bf16.msra.mxu1 %v5242_v59  ;;  %1470 = vmatprep.subr.bf16.mxu0 %v5253_v62  ;;  %v5359_v59 = vld [vmem:[%s7709_s3 + $0x280] ss:$16 sps:$4 sm:$0xff]  }
  0xad   :  { %1507 = vmatprep.subr.bf16.mxu1 %v5250_v61  ;;  %v5334_v61 = vld [vmem:[%s7709_s3 + $0x104] ss:$16 sps:$4 sm:$0xff]  }
  0xaf   :  { %1471 = vmatpush2.bf16.msra.mxu0 %v5251_v0  ;;  %v5332_v0 = vld [vmem:[%s7709_s3 + $0x100] ss:$16 sps:$4 sm:$0xff]  }
  0xb0   :  { %1508 = vmatpush2.bf16.msra.mxu1 %v5248_v63  ;;  %1472 = vmatprep.subr.bf16.mxu0 %v5259_v2 }
  0xb1   :  { %1509 = vmatprep.subr.bf16.mxu1 %v5256_v1  ;;  %v5367_v1 = vld [vmem:[%s7709_s3 + $0x264] ss:$16 sps:$4 sm:$0xff]  }
  0xb3   :  { %1473 = vmatpush2.bf16.msra.mxu0 %v5257_v4  ;;  %v5337_v4 = vld [vmem:[%s7709_s3 + $0xec] ss:$16 sps:$4 sm:$0xff]  }
  0xb4   :  { %1510 = vmatpush2.bf16.msra.mxu1 %v5254_v3  ;;  %1474 = vmatprep.subr.bf16.mxu0 %v5265_v6 }
  0xb5   :  { %1511 = vmatprep.subr.bf16.mxu1 %v5262_v5  ;;  %v5365_v5 = vld [vmem:[%s7709_s3 + $0x260] ss:$16 sps:$4 sm:$0xff]  }
  0xb7   :  { %1475 = vmatpush2.bf16.msra.mxu0 %v5263_v10  ;;  %v5373_v10 = vld [vmem:[%s7709_s3 + $0x244] ss:$16 sps:$4 sm:$0xff]  }
  0xb8   :  { %1512 = vmatpush2.bf16.msra.mxu1 %v5260_v7  ;;  %1476 = vmatprep.subr.bf16.mxu0 %v5271_v12 }
  0xb9   :  { %1513 = vmatprep.subr.bf16.mxu1 %v5268_v11 }
  0xbb   :  { %1477 = vmatpush2.bf16.msra.mxu0 %v5269_v14 }
  0xbc   :  { %1514 = vmatpush2.bf16.msra.mxu1 %v5266_v13  ;;  %1478 = vmatprep.subr.bf16.mxu0 %v5277_v17  ;;  %v5371_v13 = vld [vmem:[%s7709_s3 + $0x240] ss:$16 sps:$4 sm:$0xff]  }
  0xbd   :  { %1515 = vmatprep.subr.bf16.mxu1 %v5274_v15  ;;  %v5379_v15 = vld [vmem:[%s7709_s3 + $0x224] ss:$16 sps:$4 sm:$0xff]  }
  0xbf   :  { %1479 = vmatpush2.bf16.msra.mxu0 %v5275_v21 }
  0xc0   :  { %1516 = vmatpush2.bf16.msra.mxu1 %v5272_v18  ;;  %1544 = vmatprep.subr.bf16.mxu0 %v5283_v23  ;;  %v5377_v18 = vld [vmem:[%s7709_s3 + $0x220] ss:$16 sps:$4 sm:$0xff]  }
  0xc1   :  { %1517 = vmatprep.subr.bf16.mxu1 %v5280_v22  ;;  %v5385_v22 = vld [vmem:[%s7709_s3 + $0x204] ss:$16 sps:$4 sm:$0xff]  }
  0xc2   :  { %1481 = vmatmul.mubr.bf16.vlgmr.msra.gmra.mxu0 %v6097_v9  ;;  %v5290_v9 = vld [vmem:[%s7709_s3 + $0xc0] ss:$16 sps:$4 sm:$0xff]  }
  0xc3   :  { %1545 = vmatpush1.bf16.msra.mxu0 %v5281_v25  ;;  %1562 = vmatprep.mubr.bf16.mxu0 %v5838_v16  ;;  %v5295_v16 = vld [vmem:[%s7709_s3 + $0xa4] ss:$16 sps:$4 sm:$0xff]  }
  0xc4   :  { %1518 = vmatpush2.bf16.msra.mxu1 %v5278_v24  ;;  %2393 = vmatprep.subr.bf16.mxu0 %v5289_v27  ;;  %v5383_v24 = vld [vmem:[%s7709_s3 + $0x200] ss:$16 sps:$4 sm:$0xff]   ;;  %v5391_v25 = vld [vmem:[%s7709_s3 + $0x3e4] ss:$16 sps:$4 sm:$0xff]  }
  0xc5   :  { %1519 = vmatprep.subr.bf16.mxu1 %v5286_v26  ;;  %v5389_v26 = vld [vmem:[%s7709_s3 + $0x3e0] ss:$16 sps:$4 sm:$0xff]   ;;  %v5397_v27 = vld [vmem:[%s7709_s3 + $0x3c4] ss:$16 sps:$4 sm:$0xff]  }
  0xc8   :  { %1520 = vmatpush2.bf16.msra.mxu1 %v5284_v28  ;;  %v5395_v28 = vld [vmem:[%s7709_s3 + $0x3c0] ss:$16 sps:$4 sm:$0xff]  }
  0xc9   :  { %2434 = vmatprep.subr.bf16.mxu1 %v5343_v47 }
  0xca   :  { %4587 = vmatmul.mubr.msk.bf16.vlgmr.msra.gmra.mxu0 %vm1239_vm0, %v6126_v19  ;;  %v5298_v19 = vld [vmem:[%s7709_s3 + $0x84] ss:$16 sps:$4 sm:$0xff]  }
  0xcb   :  { %1522 = vmatmul.mubr.bf16.vlgmr.msra.gmra.mxu1 %v6308_v20  ;;  %2394 = vmatpush1.bf16.msra.mxu0 %v5287_v29  ;;  %v5296_v20 = vld [vmem:[%s7709_s3 + $0x80] ss:$16 sps:$4 sm:$0xff]   ;;  %v5403_v29 = vld [vmem:[%s7709_s3 + $0x3a4] ss:$16 sps:$4 sm:$0xff]  }
  0xcc   :  { %2395 = vmatprep.subr.bf16.mxu0 %v5292_v30  ;;  %2435 = vmatpush1.bf16.msra.mxu1 %v5341_v46  ;;  %v5401_v30 = vld [vmem:[%s7709_s3 + $0x3a0] ss:$16 sps:$4 sm:$0xff]  }
  0xcd   :  { %2436 = vmatprep.subr.bf16.mxu1 %v5349_v51 }
  0xcf   :  { %2396 = vmatpush1.bf16.msra.mxu0 %v5290_v9  ;;  %v5409_v9 = vld [vmem:[%s7709_s3 + $0x384] ss:$16 sps:$4 sm:$0xff]  }
  0xd0   :  { %2397 = vmatprep.subr.bf16.mxu0 %v5295_v16  ;;  %2437 = vmatpush1.bf16.msra.mxu1 %v5347_v50  ;;  %v5407_v16 = vld [vmem:[%s7709_s3 + $0x380] ss:$16 sps:$4 sm:$0xff]  }
  0xd1   :  { %2438 = vmatprep.subr.bf16.mxu1 %v5355_v56 }
  0xd3   :  { %2398 = vmatpush1.bf16.msra.mxu0 %v5293_v52  ;;  %v5415_v52 = vld [vmem:[%s7709_s3 + $0x364] ss:$16 sps:$4 sm:$0xff]  }
  0xd4   :  { %2399 = vmatprep.subr.bf16.mxu0 %v5298_v19  ;;  %2439 = vmatpush1.bf16.msra.mxu1 %v5353_v55  ;;  %v5413_v19 = vld [vmem:[%s7709_s3 + $0x360] ss:$16 sps:$4 sm:$0xff]  }
  0xd5   :  { %2440 = vmatprep.subr.bf16.mxu1 %v5361_v60 }
  0xd7   :  { %2400 = vmatpush1.bf16.msra.mxu0 %v5296_v20  ;;  %v5421_v20 = vld [vmem:[%s7709_s3 + $0x344] ss:$16 sps:$4 sm:$0xff]  }
  0xd8   :  { %2401 = vmatprep.subr.bf16.mxu0 %v5301_v31  ;;  %2441 = vmatpush1.bf16.msra.mxu1 %v5359_v59  ;;  %v5419_v31 = vld [vmem:[%s7709_s3 + $0x340] ss:$16 sps:$4 sm:$0xff]  }
  0xd9   :  { %2442 = vmatprep.subr.bf16.mxu1 %v5367_v1 }
  0xdb   :  { %2402 = vmatpush1.bf16.msra.mxu0 %v5299_v32  ;;  %v5427_v32 = vld [vmem:[%s7709_s3 + $0x324] ss:$16 sps:$4 sm:$0xff]  }
  0xdc   :  { %2403 = vmatprep.subr.bf16.mxu0 %v5304_v33  ;;  %2443 = vmatpush1.bf16.msra.mxu1 %v5365_v5  ;;  %v5425_v33 = vld [vmem:[%s7709_s3 + $0x320] ss:$16 sps:$4 sm:$0xff]  }
  0xdd   :  { %2444 = vmatprep.subr.bf16.mxu1 %v5373_v10 }
  0xdf   :  { %2404 = vmatpush1.bf16.msra.mxu0 %v5302_v8  ;;  %v239_v8 = vlaneseq }
  0xe0   :  { %2405 = vmatprep.subr.bf16.mxu0 %v5307_v34  ;;  %2445 = vmatpush1.bf16.msra.mxu1 %v5371_v13  ;;  %v5430_v34 = vld [vmem:[%s7709_s3 + $0x304] ss:$16 sps:$4 sm:$0xff]   ;;  %v5346_v13 = vld [vmem:[%s7709_s3 + $0xac] ss:$16 sps:$4 sm:$0xff]  }
  0xe1   :  { %2446 = vmatprep.subr.bf16.mxu1 %v5379_v15  ;;  %v5352_v15 = vld [vmem:[%s7709_s3 + $0x8c] ss:$16 sps:$4 sm:$0xff]  }
  0xe3   :  { %2406 = vmatpush1.bf16.msra.mxu0 %v5305_v35  ;;  %v5428_v35 = vld [vmem:[%s7709_s3 + $0x300] ss:$16 sps:$4 sm:$0xff]  }
  0xe4   :  { %2407 = vmatprep.subr.bf16.mxu0 %v5310_v37  ;;  %2447 = vmatpush1.bf16.msra.mxu1 %v5377_v18  ;;  %v6725_v37 = vshrl.u32 %v239_v8, 7  ;;  %v5358_v18 = vld [vmem:[%s7709_s3 + $0x6c] ss:$16 sps:$4 sm:$0xff]  }
  0xe5   :  { %2448 = vmatprep.subr.bf16.mxu1 %v5385_v22  ;;  %v5364_v22 = vld [vmem:[%s7709_s3 + $0x4c] ss:$16 sps:$4 sm:$0xff]  }
  0xe7   :  { %2408 = vmatpush1.bf16.msra.mxu0 %v5308_v36  ;;  %v5433_v36 = vld [vmem:[%s7709_s3 + $0x2ec] ss:$16 sps:$4 sm:$0xff]  }
  0xe8   :  { %2409 = vmatprep.subr.bf16.mxu0 %v5313_v38  ;;  %2449 = vmatpush1.bf16.msra.mxu1 %v5383_v24  ;;  %v6731_v38 = vsub.s32 0, %v6725_v37  ;;  %v5362_v24 = vld [vmem:[%s7709_s3 + $0x48] ss:$16 sps:$4 sm:$0xff]  }
  0xe9   :  { %2450 = vmatprep.subr.bf16.mxu1 %v5391_v25  ;;  %v5370_v25 = vld [vmem:[%s7709_s3 + $0x2c] ss:$16 sps:$4 sm:$0xff]  }
  0xeb   :  { %2410 = vmatpush2.bf16.msra.mxu0 %v5311_v39  ;;  %v6736_v39 = vld [vmem:[%s7710_s2] sm:$0xf] }
  0xec   :  { %2411 = vmatprep.subr.bf16.mxu0 %v5316_v40  ;;  %2451 = vmatpush2.bf16.msra.mxu1 %v5389_v26  ;;  %v6739_v40 = vsub.s32 1, %v6725_v37  ;;  %v6793_v26 = vsub.s32 3, %v6725_v37 }
  0xed   :  { %2452 = vmatprep.subr.bf16.mxu1 %v5397_v27 }
  0xef   :  { %2412 = vmatpush2.bf16.msra.mxu0 %v5314_v41  ;;  %v242_v41 = vrot.slane %v6736_v39, %v6731_v38 }
  0xf0   :  { %2413 = vmatprep.subr.bf16.mxu0 %v5319_v42  ;;  %2453 = vmatpush2.bf16.msra.mxu1 %v5395_v28  ;;  %v246_v42 = vrot.slane %v6736_v39, %v6739_v40 }
  0xf1   :  { %2454 = vmatprep.subr.bf16.mxu1 %v5403_v29  ;;  %v5368_v29 = vld [vmem:[%s7709_s3 + $0x28] ss:$16 sps:$4 sm:$0xff]  }
  0xf3   :  { %2414 = vmatpush2.bf16.msra.mxu0 %v5317_v43 }
  0xf4   :  { %2415 = vmatprep.subr.bf16.mxu0 %v5322_v44  ;;  %2455 = vmatpush2.bf16.msra.mxu1 %v5401_v30 }
  0xf5   :  { %2456 = vmatprep.subr.bf16.mxu1 %v5409_v9  ;;  %v5376_v9 = vld [vmem:[%s7709_s3 + $0xc] ss:$16 sps:$4 sm:$0xff]  }
  0xf7   :  { %2416 = vmatpush2.bf16.msra.mxu0 %v5320_v45 }
  0xf8   :  { %2417 = vmatprep.subr.bf16.mxu0 %v5325_v48  ;;  %2457 = vmatpush2.bf16.msra.mxu1 %v5407_v16  ;;  %v254_v16 = vrot.slane %v6736_v39, %v6793_v26 }
  0xf9   :  { %2458 = vmatprep.subr.bf16.mxu1 %v5415_v52 }
  0xfb   :  { %2418 = vmatpush2.bf16.msra.mxu0 %v5323_v49 }
  0xfc   :  { %2419 = vmatprep.subr.bf16.mxu0 %v5328_v53  ;;  %2459 = vmatpush2.bf16.msra.mxu1 %v5413_v19 }
  0xfd   :  { %2460 = vmatprep.subr.bf16.mxu1 %v5421_v20  ;;  %v5374_v20 = vld [vmem:[%s7709_s3 + $0x8] ss:$16 sps:$4 sm:$0xff]  }
  0xff   :  { %2420 = vmatpush2.bf16.msra.mxu0 %v5326_v54 }
 0x100   :  { %2421 = vmatprep.subr.bf16.mxu0 %v5331_v57  ;;  %2461 = vmatpush2.bf16.msra.mxu1 %v5419_v31 }
 0x101   :  { %2462 = vmatprep.subr.bf16.mxu1 %v5427_v32  ;;  %v5382_v32 = vld [vmem:[%s7709_s3 + $0x1ec] ss:$16 sps:$4 sm:$0xff]  }
 0x102   :  { %v6637_v62 = vpop.f32.mrf.mxu0 }
 0x103   :  { %v6639_v63 = vpop.f32.mrf.mxu1  ;;  %2422 = vmatpush2.bf16.msra.mxu0 %v5329_v58  ;;  %v1278_v43 = vadd.f32 %v6637_v62, %v242_v41 }
 0x104   :  { %v6647_v2 = vpop.f32.mrf.mxu0  ;;  %2423 = vmatprep.subr.bf16.mxu0 %v5334_v61  ;;  %2463 = vmatpush2.bf16.msra.mxu1 %v5425_v33 }
 0x105   :  { %v6649_v3 = vpop.f32.mrf.mxu1  ;;  %2464 = vmatprep.subr.bf16.mxu1 %v5430_v34  ;;  %v1280_v44 = vadd.f32 %v6647_v2, %v246_v42  ;;  %v1319_v45 = vadd.f32 %v6639_v63, %v1278_v43 }
 0x106   :  { %v1281_v6 = vpop.f32.mrf.mxu0 }
 0x107   :  { %v1322_v7 = vpop.f32.mrf.mxu1  ;;  %2424 = vmatpush2.bf16.msra.mxu0 %v5332_v0  ;;  %v1321_v47 = vadd.f32 %v6649_v3, %v1280_v44  ;;  %v5388_v44 = vld [vmem:[%s7709_s3 + $0x1cc] ss:$16 sps:$4 sm:$0xff]  }
 0x108   :  { %v1282_v11 = vpop.f32.mrf.mxu0  ;;  %2475 = vmatprep.subr.bf16.mxu0 %v5337_v4  ;;  %2465 = vmatpush2.bf16.msra.mxu1 %v5428_v35  ;;  %v5335_v7 = vld [vmem:[%s7709_s3 + $0xe8] ss:$16 sps:$4 sm:$0xff]  }
 0x109   :  { %v1323_v12 = vpop.f32.mrf.mxu1  ;;  %2516 = vmatprep.subr.bf16.mxu1 %v5433_v36  ;;  %v5340_v11 = vld [vmem:[%s7709_s3 + $0xcc] ss:$16 sps:$4 sm:$0xff]  }
 0x10a   :  { %v5338_v12 = vld [vmem:[%s7709_s3 + $0xc8] ss:$16 sps:$4 sm:$0xff]  }
 0x10b   :  { %v1400_v14 = vpop.f32.mrf.mxu1 }
 0x10d   :  { %v6666_v17 = vpop.f32.mrf.mxu1 }
 0x10f   :  { %v1404_v21 = vpop.f32.mrf.mxu1 }
 0x110   :  { %v5356_v21 = vld [vmem:[%s7709_s3 + $0x68] ss:$16 sps:$4 sm:$0xff]  }
 0x111   :  { %v1405_v23 = vpop.f32.mrf.mxu1 }
 0x112   :  { %v6784_v23 = vsub.s32 2, %v6725_v37 }
 0x114   :  { %v250_v28 = vrot.slane %v6736_v39, %v6784_v23  ;;  %v5380_v39 = vld [vmem:[%s7709_s3 + $0x1e8] ss:$16 sps:$4 sm:$0xff]  }
 0x142   :  { %v1359_v46 = vpop.f32.mrf.mxu0 }
 0x143   :  { %v1360_v48 = vadd.f32 %v1359_v46, %v1319_v45 }
 0x144   :  { %v1361_v49 = vpop.f32.mrf.mxu0 }
 0x145   :  { %v1401_v50 = vadd.f32 %v1400_v14, %v1360_v48  ;;  %v1362_v51 = vadd.f32 %v1361_v49, %v1321_v47  ;;  %v5344_v14 = vld [vmem:[%s7709_s3 + $0xa8] ss:$16 sps:$4 sm:$0xff]  }
 0x146   :  { %v1363_v53 = vpop.f32.mrf.mxu0 }
 0x147   :  { %v4588_v54 = vmul.f32 -1.442695, %v1401_v50  ;;  %v1403_v55 = vadd.f32 %v6666_v17, %v1362_v51  ;;  %v5350_v17 = vld [vmem:[%s7709_s3 + $0x88] ss:$16 sps:$4 sm:$0xff]  }
 0x148   :  { %v1364_v56 = vpop.f32.mrf.mxu0  ;;  %v5386_v51 = vld [vmem:[%s7709_s3 + $0x1c8] ss:$16 sps:$4 sm:$0xff]  }
 0x149   :  { %5799 = vpow2.f32 %v4588_v54  ;;  %v4589_v57 = vmul.f32 -1.442695, %v1403_v55 }
 0x14b   :  { %v1441_v58 = vpop.f32.mrf.mxu1  ;;  %5801 = vpow2.f32 %v4589_v57  ;;  %v5392_v57 = vld [vmem:[%s7709_s3 + $0x1a8] ss:$16 sps:$4 sm:$0xff]  }
 0x14c   :  { %v1442_v19 = vadd.f32 %v1441_v58, %v250_v28  ;;  %v5400_v58 = vld [vmem:[%s7709_s3 + $0x18c] ss:$16 sps:$4 sm:$0xff]   ;;  %v5437_v28 = vld [vmem:[%s7709_s3 + $0x2a8] ss:$16 sps:$4 sm:$0xff]  }
 0x14d   :  { %v1443_v59 = vpop.f32.mrf.mxu1 }
 0x14e   :  { %v1444_v33 = vadd.f32 %v1443_v59, %v254_v16  ;;  %v5398_v59 = vld [vmem:[%s7709_s3 + $0x188] ss:$16 sps:$4 sm:$0xff]  }
 0x14f   :  { %v1445_v60 = vpop.f32.mrf.mxu1  ;;  %v5485_v16 = vld [vmem:[%s7711_s5 + $0x118] ss:$28 sps:$4 sm:$0xff]  }
 0x150   :  { %v5406_v60 = vld [vmem:[%s7709_s3 + $0x16c] ss:$16 sps:$4 sm:$0xff]  }
 0x151   :  { %v1446_v61 = vpop.f32.mrf.mxu1 }
 0x152   :  { %v5404_v61 = vld [vmem:[%s7709_s3 + $0x168] ss:$16 sps:$4 sm:$0xff]  }
 0x156   :  { %v5800_v62 = vpop.eup %5799 }
 0x157   :  { %v1583_v63 = vadd.f32 1.0, %v5800_v62  ;;  %v5412_v62 = vld [vmem:[%s7709_s3 + $0x14c] ss:$16 sps:$4 sm:$0xff]  }
 0x158   :  { %v5802_v0 = vpop.eup %5801 }
 0x159   :  { %5803 = vrcp.f32 %v1583_v63  ;;  %v1584_v1 = vadd.f32 1.0, %v5802_v0 }
 0x15b   :  { %5805 = vrcp.f32 %v1584_v1  ;;  %v5410_v1 = vld [vmem:[%s7709_s3 + $0x148] ss:$16 sps:$4 sm:$0xff]  }
 0x166   :  { %v5804_v2 = vpop.eup %5803 }
 0x167   :  { %v1595_v4 = vmul.f32 %v5804_v2, %v1401_v50 }
 0x168   :  { %v5806_v3 = vpop.eup %5805 }
 0x169   :  { %v1596_v5 = vmul.f32 %v5806_v3, %v1403_v55  ;;  %v6753_v10 = vpack.c.bf16 %v1595_v4, %v1595_v4  ;;  %v5394_v55 = vld [vmem:[%s7709_s3 + $0x1ac] ss:$16 sps:$4 sm:$0xff]  }
 0x16a   :  { %v5418_v3 = vld [vmem:[%s7709_s3 + $0x12c] ss:$16 sps:$4 sm:$0xff]  }
 0x16b   :  { %v1600_v6 = vpack.c.bf16 %v1596_v5, %v1596_v5  ;;  %v5416_v5 = vld [vmem:[%s7709_s3 + $0x128] ss:$16 sps:$4 sm:$0xff]  }
 0x16d   :  { %2425 = vmatprep.mubr.bf16.mxu0 %v1600_v6 }
 0x16e   :  { %2426 = vmatmul.mubr.bf16.vlgmr.msra.gmra.mxu0 %v6753_v10 }
 0x16f   :  { %2476 = vmatpush1.bf16.msra.mxu0 %v5335_v7  ;;  %2507 = vmatprep.mubr.bf16.mxu0 %v1600_v6  ;;  %v5424_v6 = vld [vmem:[%s7709_s3 + $0x10c] ss:$16 sps:$4 sm:$0xff]   ;;  %v5422_v7 = vld [vmem:[%s7709_s3 + $0x108] ss:$16 sps:$4 sm:$0xff]  }
 0x170   :  { %2477 = vmatprep.subr.bf16.mxu0 %v5340_v11 }
 0x173   :  { %2478 = vmatpush1.bf16.msra.mxu0 %v5338_v12 }
 0x174   :  { %2479 = vmatprep.subr.bf16.mxu0 %v5346_v13 }
 0x177   :  { %2480 = vmatpush1.bf16.msra.mxu0 %v5344_v14 }
 0x178   :  { %2481 = vmatprep.subr.bf16.mxu0 %v5352_v15 }
 0x17b   :  { %2482 = vmatpush1.bf16.msra.mxu0 %v5350_v17  ;;  %v5431_v17 = vld [vmem:[%s7709_s3 + $0x2e8] ss:$16 sps:$4 sm:$0xff]  }
 0x17c   :  { %2483 = vmatprep.subr.bf16.mxu0 %v5358_v18 }
 0x17f   :  { %2484 = vmatpush1.bf16.msra.mxu0 %v5356_v21  ;;  %v5436_v21 = vld [vmem:[%s7709_s3 + $0x2cc] ss:$16 sps:$4 sm:$0xff]  }
 0x180   :  { %2485 = vmatprep.subr.bf16.mxu0 %v5364_v22  ;;  %v5479_v22 = vld [vmem:[%s7711_s5 + $0x188] ss:$28 sps:$4 sm:$0xff]  }
 0x182   :  { %v1482_v27 = vpop.f32.mrf.mxu0 }
 0x183   :  { %2486 = vmatpush1.bf16.msra.mxu0 %v5362_v24  ;;  %v1483_v8 = vadd.f32 %v1482_v27, %v1442_v19  ;;  %v5434_v24 = vld [vmem:[%s7709_s3 + $0x2c8] ss:$16 sps:$4 sm:$0xff]   ;;  %v5439_v27 = vld [vmem:[%s7709_s3 + $0x2ac] ss:$16 sps:$4 sm:$0xff]  }
 0x184   :  { %v1484_v30 = vpop.f32.mrf.mxu0  ;;  %2487 = vmatprep.subr.bf16.mxu0 %v5370_v25  ;;  %v5484_v25 = vld [vmem:[%s7711_s5 + $0x154] ss:$28 sps:$4 sm:$0xff]   ;;  %v5440_v19 = vld [vmem:[%s7709_s3 + $0x288] ss:$16 sps:$4 sm:$0xff]  }
 0x185   :  { %v1485_v36 = vadd.f32 %v1484_v30, %v1444_v33  ;;  %v5442_v30 = vld [vmem:[%s7709_s3 + $0x28c] ss:$16 sps:$4 sm:$0xff]  }
 0x186   :  { %v1486_v52 = vpop.f32.mrf.mxu0  ;;  %v5448_v33 = vld [vmem:[%s7709_s3 + $0x24c] ss:$16 sps:$4 sm:$0xff]  }
 0x187   :  { %2488 = vmatpush1.bf16.msra.mxu0 %v5368_v29  ;;  %v5482_v29 = vld [vmem:[%s7711_s5 + $0x150] ss:$28 sps:$4 sm:$0xff]   ;;  %v5490_v52 = vld [vmem:[%s7711_s5 + $0xe4] ss:$28 sps:$4 sm:$0xff]  }
 0x188   :  { %v1487_v31 = vpop.f32.mrf.mxu0  ;;  %2489 = vmatprep.subr.bf16.mxu0 %v5376_v9  ;;  %v5487_v9 = vld [vmem:[%s7711_s5 + $0x11c] ss:$28 sps:$4 sm:$0xff]  }
 0x189   :  { %v5488_v31 = vld [vmem:[%s7711_s5 + $0xe0] ss:$28 sps:$4 sm:$0xff]  }
 0x18a   :  { %v1564_v35 = vpop.f32.mrf.mxu0 }
 0x18b   :  { %v1523_v34 = vpop.f32.mrf.mxu1  ;;  %2490 = vmatpush1.bf16.msra.mxu0 %v5374_v20  ;;  %v5445_v20 = vld [vmem:[%s7709_s3 + $0x26c] ss:$16 sps:$4 sm:$0xff]  }
 0x18c   :  { %v1524_v41 = vadd.f32 %v1523_v34, %v1483_v8  ;;  %v1566_v43 = vpop.f32.mrf.mxu0  ;;  %2491 = vmatprep.subr.bf16.mxu0 %v5382_v32  ;;  %v5443_v32 = vld [vmem:[%s7709_s3 + $0x268] ss:$16 sps:$4 sm:$0xff]   ;;  %v5451_v34 = vld [vmem:[%s7709_s3 + $0x22c] ss:$16 sps:$4 sm:$0xff]  }
 0x18d   :  { %v1525_v42 = vpop.f32.mrf.mxu1  ;;  %v5446_v8 = vld [vmem:[%s7709_s3 + $0x248] ss:$16 sps:$4 sm:$0xff]  }
 0x18e   :  { %v1565_v45 = vadd.f32 %v1564_v35, %v1524_v41  ;;  %v1526_v46 = vadd.f32 %v1525_v42, %v1485_v36  ;;  %v1568_v48 = vpop.f32.mrf.mxu0  ;;  %v5449_v35 = vld [vmem:[%s7709_s3 + $0x228] ss:$16 sps:$4 sm:$0xff]   ;;  %v5454_v36 = vld [vmem:[%s7709_s3 + $0x20c] ss:$16 sps:$4 sm:$0xff]  }
 0x18f   :  { %v1527_v47 = vpop.f32.mrf.mxu1  ;;  %2492 = vmatpush2.bf16.msra.mxu0 %v5380_v39  ;;  %v5452_v41 = vld [vmem:[%s7709_s3 + $0x208] ss:$16 sps:$4 sm:$0xff]   ;;  %v5457_v39 = vld [vmem:[%s7709_s3 + $0x3ec] ss:$16 sps:$4 sm:$0xff]  }
 0x190   :  { %v4590_v49 = vmul.f32 -1.442695, %v1565_v45  ;;  %v1567_v50 = vadd.f32 %v1566_v43, %v1526_v46  ;;  %v1569_v54 = vpop.f32.mrf.mxu0  ;;  %2493 = vmatprep.subr.bf16.mxu0 %v5388_v44  ;;  %v5455_v42 = vld [vmem:[%s7709_s3 + $0x3e8] ss:$16 sps:$4 sm:$0xff]   ;;  %v5460_v43 = vld [vmem:[%s7709_s3 + $0x3cc] ss:$16 sps:$4 sm:$0xff]  }
 0x191   :  { %v1528_v53 = vpop.f32.mrf.mxu1  ;;  %v5458_v44 = vld [vmem:[%s7709_s3 + $0x3c8] ss:$16 sps:$4 sm:$0xff]   ;;  %v5466_v47 = vld [vmem:[%s7709_s3 + $0x38c] ss:$16 sps:$4 sm:$0xff]  }
 0x192   :  { %5807 = vpow2.f32 %v4590_v49  ;;  %v4591_v56 = vmul.f32 -1.442695, %v1567_v50  ;;  %v5461_v46 = vld [vmem:[%s7709_s3 + $0x3a8] ss:$16 sps:$4 sm:$0xff]   ;;  %v5469_v49 = vld [vmem:[%s7709_s3 + $0x36c] ss:$16 sps:$4 sm:$0xff]  }
 0x193   :  { %2494 = vmatpush2.bf16.msra.mxu0 %v5386_v51  ;;  %v5464_v48 = vld [vmem:[%s7709_s3 + $0x388] ss:$16 sps:$4 sm:$0xff]   ;;  %v5472_v51 = vld [vmem:[%s7709_s3 + $0x34c] ss:$16 sps:$4 sm:$0xff]  }
 0x194   :  { %5809 = vpow2.f32 %v4591_v56  ;;  %2495 = vmatprep.subr.bf16.mxu0 %v5394_v55  ;;  %v5470_v53 = vld [vmem:[%s7709_s3 + $0x348] ss:$16 sps:$4 sm:$0xff]   ;;  %v5475_v54 = vld [vmem:[%s7709_s3 + $0x32c] ss:$16 sps:$4 sm:$0xff]  }
 0x195   :  { %v5473_v55 = vld [vmem:[%s7709_s3 + $0x328] ss:$16 sps:$4 sm:$0xff]   ;;  %v5478_v56 = vld [vmem:[%s7709_s3 + $0x30c] ss:$16 sps:$4 sm:$0xff]  }
 0x197   :  { %2496 = vmatpush2.bf16.msra.mxu0 %v5392_v57  ;;  %v5476_v57 = vld [vmem:[%s7709_s3 + $0x308] ss:$16 sps:$4 sm:$0xff]  }
 0x198   :  { %2497 = vmatprep.subr.bf16.mxu0 %v5400_v58  ;;  %v5493_v58 = vld [vmem:[%s7711_s5 + $0xac] ss:$28 sps:$4 sm:$0xff]  }
 0x19b   :  { %2498 = vmatpush2.bf16.msra.mxu0 %v5398_v59  ;;  %v5491_v59 = vld [vmem:[%s7711_s5 + $0xa8] ss:$28 sps:$4 sm:$0xff]  }
 0x19c   :  { %2499 = vmatprep.subr.bf16.mxu0 %v5406_v60  ;;  %v5494_v60 = vld [vmem:[%s7711_s5 + $0x70] ss:$28 sps:$4 sm:$0xff]  }
 0x19f   :  { %v5808_v63 = vpop.eup %5807  ;;  %2500 = vmatpush2.bf16.msra.mxu0 %v5404_v61  ;;  %v5496_v61 = vld [vmem:[%s7711_s5 + $0x74] ss:$28 sps:$4 sm:$0xff]  }
 0x1a0   :  { %v1585_v0 = vadd.f32 1.0, %v5808_v63  ;;  %2501 = vmatprep.subr.bf16.mxu0 %v5412_v62  ;;  %v5499_v62 = vld [vmem:[%s7711_s5 + $0x3c] ss:$28 sps:$4 sm:$0xff]  }
 0x1a1   :  { %v5810_v2 = vpop.eup %5809  ;;  %v5497_v63 = vld [vmem:[%s7711_s5 + $0x38] ss:$28 sps:$4 sm:$0xff]  }
 0x1a2   :  { %5811 = vrcp.f32 %v1585_v0  ;;  %v1586_v4 = vadd.f32 1.0, %v5810_v2  ;;  %v5502_v0 = vld [vmem:[%s7711_s5 + $0x4] ss:$28 sps:$4 sm:$0xff]   ;;  %v5505_v2 = vld [vmem:[%s7711_s5 + $0x34c] ss:$28 sps:$4 sm:$0xff]  }
 0x1a3   :  { %2502 = vmatpush2.bf16.msra.mxu0 %v5410_v1  ;;  %v5500_v1 = vld [vmem:[%s7711_s5] ss:$28 sps:$4 sm:$0xff]  }
 0x1a4   :  { %5813 = vrcp.f32 %v1586_v4  ;;  %2503 = vmatprep.subr.bf16.mxu0 %v5418_v3  ;;  %v5503_v3 = vld [vmem:[%s7711_s5 + $0x348] ss:$28 sps:$4 sm:$0xff]   ;;  %v5508_v4 = vld [vmem:[%s7711_s5 + $0x314] ss:$28 sps:$4 sm:$0xff]  }
 0x1a7   :  { %2504 = vmatpush2.bf16.msra.mxu0 %v5416_v5  ;;  %v5506_v5 = vld [vmem:[%s7711_s5 + $0x310] ss:$28 sps:$4 sm:$0xff]  }
 0x1a8   :  { %2505 = vmatprep.subr.bf16.mxu0 %v5424_v6  ;;  %v5511_v6 = vld [vmem:[%s7711_s5 + $0x2dc] ss:$28 sps:$4 sm:$0xff]  }
 0x1ab   :  { %2506 = vmatpush2.bf16.msra.mxu0 %v5422_v7  ;;  %v5509_v7 = vld [vmem:[%s7711_s5 + $0x2d8] ss:$28 sps:$4 sm:$0xff]  }
 0x1ae   :  { %2508 = vmatmul.mubr.bf16.vlgmr.msra.gmra.mxu0 %v6753_v10  ;;  %v5481_v10 = vld [vmem:[%s7711_s5 + $0x18c] ss:$28 sps:$4 sm:$0xff]  }
 0x1af   :  { %v5812_v11 = vpop.eup %5811  ;;  %4034 = vmatprep.subr.bf16.mxu0 %v5481_v10  ;;  %v5524_v10 = vld [vmem:[%s7711_s5 + $0x1c0] ss:$28 sps:$4 sm:$0xff]  }
 0x1b0   :  { %v1597_v13 = vmul.f32 %v5812_v11, %v1565_v45  ;;  %4035 = vmatpush1.bf16.msra.mxu0 %v5479_v22  ;;  %v5463_v45 = vld [vmem:[%s7709_s3 + $0x3ac] ss:$16 sps:$4 sm:$0xff]   ;;  %v5514_v11 = vld [vmem:[%s7711_s5 + $0x2a4] ss:$28 sps:$4 sm:$0xff]  }
 0x1b1   :  { %v5814_v12 = vpop.eup %5813  ;;  %4036 = vmatprep.subr.bf16.mxu0 %v5484_v25  ;;  %v5526_v22 = vld [vmem:[%s7711_s5 + $0x1c4] ss:$28 sps:$4 sm:$0xff]   ;;  %v5529_v25 = vld [vmem:[%s7711_s5 + $0x50c] ss:$28 sps:$4 sm:$0xff]  }
 0x1b2   :  { %v1598_v14 = vmul.f32 %v5814_v12, %v1567_v50  ;;  %v6860_v18 = vpack.c.bf16 %v1597_v13, %v1597_v13  ;;  %v5467_v50 = vld [vmem:[%s7709_s3 + $0x368] ss:$16 sps:$4 sm:$0xff]   ;;  %v5512_v12 = vld [vmem:[%s7711_s5 + $0x2a0] ss:$28 sps:$4 sm:$0xff]  }
 0x1b3   :  { %v5517_v13 = vld [vmem:[%s7711_s5 + $0x26c] ss:$28 sps:$4 sm:$0xff]  }
 0x1b4   :  { %v1602_v15 = vpack.c.bf16 %v1598_v14, %v1598_v14  ;;  %4037 = vmatpush1.bf16.msra.mxu0 %v5482_v29  ;;  %v5515_v14 = vld [vmem:[%s7711_s5 + $0x268] ss:$28 sps:$4 sm:$0xff]   ;;  %v5535_v29 = vld [vmem:[%s7711_s5 + $0x4d4] ss:$28 sps:$4 sm:$0xff]  }
 0x1b5   :  { %4038 = vmatprep.subr.bf16.mxu0 %v5487_v9  ;;  %v5541_v9 = vld [vmem:[%s7711_s5 + $0x49c] ss:$28 sps:$4 sm:$0xff]  }
 0x1b6   :  { %2466 = vmatprep.mubr.bf16.mxu1 %v1602_v15 }
 0x1b7   :  { %2467 = vmatmul.mubr.bf16.vlgmr.msra.gmra.mxu1 %v6860_v18 }
 0x1b8   :  { %2517 = vmatpush1.bf16.msra.mxu1 %v5431_v17  ;;  %2548 = vmatprep.mubr.bf16.mxu1 %v1602_v15  ;;  %v5520_v15 = vld [vmem:[%s7711_s5 + $0x234] ss:$28 sps:$4 sm:$0xff]  }
 0x1b9   :  { %2518 = vmatprep.subr.bf16.mxu1 %v5436_v21  ;;  %4039 = vmatpush1.bf16.msra.mxu0 %v5485_v16  ;;  %v5518_v17 = vld [vmem:[%s7711_s5 + $0x230] ss:$28 sps:$4 sm:$0xff]   ;;  %v5521_v21 = vld [vmem:[%s7711_s5 + $0x1f8] ss:$28 sps:$4 sm:$0xff]   ;;  %v5545_v16 = vld [vmem:[%s7711_s5 + $0x460] ss:$28 sps:$4 sm:$0xff]  }
 0x1ba   :  { %4040 = vmatprep.subr.bf16.mxu0 %v5490_v52  ;;  %v5547_v52 = vld [vmem:[%s7711_s5 + $0x464] ss:$28 sps:$4 sm:$0xff]  }
 0x1bc   :  { %2519 = vmatpush1.bf16.msra.mxu1 %v5434_v24  ;;  %v5527_v24 = vld [vmem:[%s7711_s5 + $0x508] ss:$28 sps:$4 sm:$0xff]  }
 0x1bd   :  { %2520 = vmatprep.subr.bf16.mxu1 %v5439_v27  ;;  %4041 = vmatpush1.bf16.msra.mxu0 %v5488_v31  ;;  %v5532_v27 = vld [vmem:[%s7711_s5 + $0x194] ss:$28 sps:$4 sm:$0xff]  }
 0x1be   :  { %4042 = vmatprep.subr.bf16.mxu0 %v5493_v58  ;;  %v5619_v58 = vld [vmem:[%s7711_s5 + $0x544] ss:$28 sps:$4 sm:$0xff]  }
 0x1c0   :  { %2521 = vmatpush1.bf16.msra.mxu1 %v5437_v28  ;;  %v5533_v28 = vld [vmem:[%s7711_s5 + $0x4d0] ss:$28 sps:$4 sm:$0xff]  }
 0x1c1   :  { %2522 = vmatprep.subr.bf16.mxu1 %v5442_v30  ;;  %4043 = vmatpush1.bf16.msra.mxu0 %v5491_v59  ;;  %v5539_v30 = vld [vmem:[%s7711_s5 + $0x498] ss:$28 sps:$4 sm:$0xff]   ;;  %v5617_v59 = vld [vmem:[%s7711_s5 + $0x540] ss:$28 sps:$4 sm:$0xff]  }
 0x1c2   :  { %4044 = vmatprep.subr.bf16.mxu0 %v5496_v61  ;;  %v7155_v61 = vld [vmem:[%s7712_s4] sm:$0xf] }
 0x1c4   :  { %2523 = vmatpush1.bf16.msra.mxu1 %v5440_v19  ;;  %v5551_v19 = vld [vmem:[%s7711_s5 + $0x428] ss:$28 sps:$4 sm:$0xff]  }
 0x1c5   :  { %2524 = vmatprep.subr.bf16.mxu1 %v5445_v20  ;;  %4045 = vmatpush1.bf16.msra.mxu0 %v5494_v60  ;;  %v5553_v20 = vld [vmem:[%s7711_s5 + $0x42c] ss:$28 sps:$4 sm:$0xff]   ;;  %v5625_v60 = vld [vmem:[%s7711_s5 + $0x514] ss:$28 sps:$4 sm:$0xff]  }
 0x1c6   :  { %4046 = vmatprep.subr.bf16.mxu0 %v5499_v62 }
 0x1c8   :  { %2525 = vmatpush1.bf16.msra.mxu1 %v5443_v32 }
 0x1c9   :  { %2526 = vmatprep.subr.bf16.mxu1 %v5448_v33  ;;  %4047 = vmatpush1.bf16.msra.mxu0 %v5497_v63  ;;  %v5557_v33 = vld [vmem:[%s7711_s5 + $0x3f0] ss:$28 sps:$4 sm:$0xff]  }
 0x1ca   :  { %4048 = vmatprep.subr.bf16.mxu0 %v5502_v0  ;;  %v1736_v0 = vrot.slane %v7155_v61, %v6731_v38 }
 0x1cc   :  { %2527 = vmatpush1.bf16.msra.mxu1 %v5446_v8  ;;  %v5559_v8 = vld [vmem:[%s7711_s5 + $0x3f4] ss:$28 sps:$4 sm:$0xff]  }
 0x1cd   :  { %2528 = vmatprep.subr.bf16.mxu1 %v5451_v34  ;;  %4049 = vmatpush1.bf16.msra.mxu0 %v5500_v1 }
 0x1ce   :  { %4050 = vmatprep.subr.bf16.mxu0 %v5505_v2  ;;  %v1740_v2 = vrot.slane %v7155_v61, %v6739_v40 }
 0x1d0   :  { %2529 = vmatpush1.bf16.msra.mxu1 %v5449_v35 }
 0x1d1   :  { %2530 = vmatprep.subr.bf16.mxu1 %v5454_v36  ;;  %4051 = vmatpush2.bf16.msra.mxu0 %v5503_v3  ;;  %v5565_v36 = vld [vmem:[%s7711_s5 + $0x3bc] ss:$28 sps:$4 sm:$0xff]  }
 0x1d2   :  { %4052 = vmatprep.subr.bf16.mxu0 %v5508_v4 }
 0x1d4   :  { %2531 = vmatpush1.bf16.msra.mxu1 %v5452_v41  ;;  %v5563_v41 = vld [vmem:[%s7711_s5 + $0x3b8] ss:$28 sps:$4 sm:$0xff]  }
 0x1d5   :  { %2532 = vmatprep.subr.bf16.mxu1 %v5457_v39  ;;  %4053 = vmatpush2.bf16.msra.mxu0 %v5506_v5  ;;  %v5571_v39 = vld [vmem:[%s7711_s5 + $0x384] ss:$28 sps:$4 sm:$0xff]  }
 0x1d6   :  { %4054 = vmatprep.subr.bf16.mxu0 %v5511_v6 }
 0x1d8   :  { %2533 = vmatpush2.bf16.msra.mxu1 %v5455_v42  ;;  %v5569_v42 = vld [vmem:[%s7711_s5 + $0x380] ss:$28 sps:$4 sm:$0xff]  }
 0x1d9   :  { %2534 = vmatprep.subr.bf16.mxu1 %v5460_v43  ;;  %4055 = vmatpush2.bf16.msra.mxu0 %v5509_v7  ;;  %v5577_v43 = vld [vmem:[%s7711_s5 + $0x6cc] ss:$28 sps:$4 sm:$0xff]  }
 0x1da   :  { %4056 = vmatprep.subr.bf16.mxu0 %v5514_v11 }
 0x1dc   :  { %2535 = vmatpush2.bf16.msra.mxu1 %v5458_v44  ;;  %v5575_v44 = vld [vmem:[%s7711_s5 + $0x6c8] ss:$28 sps:$4 sm:$0xff]  }
 0x1dd   :  { %2536 = vmatprep.subr.bf16.mxu1 %v5463_v45  ;;  %4057 = vmatpush2.bf16.msra.mxu0 %v5512_v12  ;;  %v5583_v45 = vld [vmem:[%s7711_s5 + $0x694] ss:$28 sps:$4 sm:$0xff]  }
 0x1de   :  { %4058 = vmatprep.subr.bf16.mxu0 %v5517_v13 }
 0x1e0   :  { %2537 = vmatpush2.bf16.msra.mxu1 %v5461_v46  ;;  %v5581_v46 = vld [vmem:[%s7711_s5 + $0x690] ss:$28 sps:$4 sm:$0xff]  }
 0x1e1   :  { %2538 = vmatprep.subr.bf16.mxu1 %v5466_v47  ;;  %4059 = vmatpush2.bf16.msra.mxu0 %v5515_v14  ;;  %v5589_v47 = vld [vmem:[%s7711_s5 + $0x65c] ss:$28 sps:$4 sm:$0xff]  }
 0x1e2   :  { %4060 = vmatprep.subr.bf16.mxu0 %v5520_v15 }
 0x1e4   :  { %2539 = vmatpush2.bf16.msra.mxu1 %v5464_v48  ;;  %v5587_v48 = vld [vmem:[%s7711_s5 + $0x658] ss:$28 sps:$4 sm:$0xff]  }
 0x1e5   :  { %2540 = vmatprep.subr.bf16.mxu1 %v5469_v49  ;;  %4061 = vmatpush2.bf16.msra.mxu0 %v5518_v17  ;;  %v5595_v49 = vld [vmem:[%s7711_s5 + $0x624] ss:$28 sps:$4 sm:$0xff]  }
 0x1e8   :  { %2541 = vmatpush2.bf16.msra.mxu1 %v5467_v50  ;;  %v5593_v50 = vld [vmem:[%s7711_s5 + $0x620] ss:$28 sps:$4 sm:$0xff]  }
 0x1e9   :  { %2542 = vmatprep.subr.bf16.mxu1 %v5472_v51  ;;  %v5601_v51 = vld [vmem:[%s7711_s5 + $0x5ec] ss:$28 sps:$4 sm:$0xff]  }
 0x1ec   :  { %2543 = vmatpush2.bf16.msra.mxu1 %v5470_v53  ;;  %v5599_v53 = vld [vmem:[%s7711_s5 + $0x5e8] ss:$28 sps:$4 sm:$0xff]  }
 0x1ed   :  { %2544 = vmatprep.subr.bf16.mxu1 %v5475_v54  ;;  %v5607_v54 = vld [vmem:[%s7711_s5 + $0x5b4] ss:$28 sps:$4 sm:$0xff]  }
 0x1f0   :  { %2545 = vmatpush2.bf16.msra.mxu1 %v5473_v55  ;;  %v5605_v55 = vld [vmem:[%s7711_s5 + $0x5b0] ss:$28 sps:$4 sm:$0xff]  }
 0x1f1   :  { %2546 = vmatprep.subr.bf16.mxu1 %v5478_v56  ;;  %v5613_v56 = vld [vmem:[%s7711_s5 + $0x57c] ss:$28 sps:$4 sm:$0xff]  }
 0x1f4   :  { %2547 = vmatpush2.bf16.msra.mxu1 %v5476_v57  ;;  %v5611_v57 = vld [vmem:[%s7711_s5 + $0x578] ss:$28 sps:$4 sm:$0xff]  }
 0x1f5   :  { %4075 = vmatprep.subr.bf16.mxu1 %v5529_v25 }
 0x1f7   :  { %2549 = vmatmul.mubr.bf16.vlgmr.msra.gmra.mxu1 %v6860_v18  ;;  %v5523_v18 = vld [vmem:[%s7711_s5 + $0x1fc] ss:$28 sps:$4 sm:$0xff]  }
 0x1f8   :  { %4062 = vmatprep.subr.bf16.mxu0 %v5523_v18  ;;  %4076 = vmatpush1.bf16.msra.mxu1 %v5527_v24 }
 0x1f9   :  { %4063 = vmatpush2.bf16.msra.mxu0 %v5521_v21  ;;  %4077 = vmatprep.subr.bf16.mxu1 %v5535_v29 }
 0x1fa   :  { %4064 = vmatprep.subr.bf16.mxu0 %v5526_v22 }
 0x1fc   :  { %4078 = vmatpush1.bf16.msra.mxu1 %v5533_v28 }
 0x1fd   :  { %4065 = vmatpush2.bf16.msra.mxu0 %v5524_v10  ;;  %4079 = vmatprep.subr.bf16.mxu1 %v5541_v9 }
 0x1fe   :  { %4116 = vmatprep.subr.bf16.mxu0 %v5532_v27 }
 0x200   :  { %4080 = vmatpush1.bf16.msra.mxu1 %v5539_v30  ;;  %v5530_v30 = vld [vmem:[%s7711_s5 + $0x190] ss:$28 sps:$4 sm:$0xff]  }
 0x201   :  { %4081 = vmatprep.subr.bf16.mxu1 %v5547_v52  ;;  %v5536_v52 = vld [vmem:[%s7711_s5 + $0x158] ss:$28 sps:$4 sm:$0xff]  }
 0x204   :  { %4082 = vmatpush1.bf16.msra.mxu1 %v5545_v16  ;;  %v5538_v16 = vld [vmem:[%s7711_s5 + $0x15c] ss:$28 sps:$4 sm:$0xff]  }
 0x205   :  { %4083 = vmatprep.subr.bf16.mxu1 %v5553_v20  ;;  %v5542_v20 = vld [vmem:[%s7711_s5 + $0x120] ss:$28 sps:$4 sm:$0xff]  }
 0x208   :  { %4084 = vmatpush1.bf16.msra.mxu1 %v5551_v19  ;;  %v5544_v19 = vld [vmem:[%s7711_s5 + $0x124] ss:$28 sps:$4 sm:$0xff]  }
 0x209   :  { %4085 = vmatprep.subr.bf16.mxu1 %v5559_v8  ;;  %v5554_v8 = vld [vmem:[%s7711_s5 + $0xb0] ss:$28 sps:$4 sm:$0xff]  }
 0x20c   :  { %4086 = vmatpush1.bf16.msra.mxu1 %v5557_v33  ;;  %v5556_v33 = vld [vmem:[%s7711_s5 + $0xb4] ss:$28 sps:$4 sm:$0xff]  }
 0x20d   :  { %4087 = vmatprep.subr.bf16.mxu1 %v5565_v36  ;;  %v5560_v36 = vld [vmem:[%s7711_s5 + $0x78] ss:$28 sps:$4 sm:$0xff]  }
 0x210   :  { %4088 = vmatpush1.bf16.msra.mxu1 %v5563_v41  ;;  %v5568_v41 = vld [vmem:[%s7711_s5 + $0x44] ss:$28 sps:$4 sm:$0xff]  }
 0x211   :  { %4089 = vmatprep.subr.bf16.mxu1 %v5571_v39  ;;  %v1748_v39 = vrot.slane %v7155_v61, %v6793_v26 }
 0x214   :  { %4090 = vmatpush1.bf16.msra.mxu1 %v5569_v42 }
 0x215   :  { %4091 = vmatprep.subr.bf16.mxu1 %v5577_v43  ;;  %v5566_v43 = vld [vmem:[%s7711_s5 + $0x40] ss:$28 sps:$4 sm:$0xff]  }
 0x218   :  { %4092 = vmatpush2.bf16.msra.mxu1 %v5575_v44 }
 0x219   :  { %4093 = vmatprep.subr.bf16.mxu1 %v5583_v45  ;;  %v5574_v45 = vld [vmem:[%s7711_s5 + $0xc] ss:$28 sps:$4 sm:$0xff]  }
 0x21c   :  { %4094 = vmatpush2.bf16.msra.mxu1 %v5581_v46 }
 0x21d   :  { %4095 = vmatprep.subr.bf16.mxu1 %v5589_v47 }
 0x220   :  { %4096 = vmatpush2.bf16.msra.mxu1 %v5587_v48 }
 0x221   :  { %4097 = vmatprep.subr.bf16.mxu1 %v5595_v49 }
 0x224   :  { %4098 = vmatpush2.bf16.msra.mxu1 %v5593_v50 }
 0x225   :  { %4099 = vmatprep.subr.bf16.mxu1 %v5601_v51  ;;  %v5572_v51 = vld [vmem:[%s7711_s5 + $0x8] ss:$28 sps:$4 sm:$0xff]  }
 0x228   :  { %4100 = vmatpush2.bf16.msra.mxu1 %v5599_v53 }
 0x229   :  { %4101 = vmatprep.subr.bf16.mxu1 %v5607_v54  ;;  %v5580_v54 = vld [vmem:[%s7711_s5 + $0x354] ss:$28 sps:$4 sm:$0xff]  }
 0x22c   :  { %4102 = vmatpush2.bf16.msra.mxu1 %v5605_v55 }
 0x22d   :  { %4103 = vmatprep.subr.bf16.mxu1 %v5613_v56 }
 0x22e   :  { %v2427_v31 = vpop.f32.mrf.mxu0 }
 0x22f   :  { %v2428_v4 = vadd.f32 %v2427_v31, %v1736_v0  ;;  %v5550_v31 = vld [vmem:[%s7711_s5 + $0xec] ss:$28 sps:$4 sm:$0xff]  }
 0x230   :  { %v2429_v32 = vpop.f32.mrf.mxu0  ;;  %4104 = vmatpush2.bf16.msra.mxu1 %v5611_v57  ;;  %v5578_v57 = vld [vmem:[%s7711_s5 + $0x350] ss:$28 sps:$4 sm:$0xff]  }
 0x231   :  { %4105 = vmatprep.subr.bf16.mxu1 %v5619_v58  ;;  %v2430_v6 = vadd.f32 %v2429_v32, %v1740_v2  ;;  %v5548_v32 = vld [vmem:[%s7711_s5 + $0xe8] ss:$28 sps:$4 sm:$0xff]   ;;  %v5586_v58 = vld [vmem:[%s7711_s5 + $0x31c] ss:$28 sps:$4 sm:$0xff]  }
 0x232   :  { %v2431_v34 = vpop.f32.mrf.mxu0 }
 0x233   :  { %v5562_v34 = vld [vmem:[%s7711_s5 + $0x7c] ss:$28 sps:$4 sm:$0xff]  }
 0x234   :  { %v2432_v35 = vpop.f32.mrf.mxu0  ;;  %4106 = vmatpush2.bf16.msra.mxu1 %v5617_v59  ;;  %v5584_v59 = vld [vmem:[%s7711_s5 + $0x318] ss:$28 sps:$4 sm:$0xff]  }
 0x235   :  { %4157 = vmatprep.subr.bf16.mxu1 %v5625_v60  ;;  %v1744_v35 = vrot.slane %v7155_v61, %v6784_v23  ;;  %v5592_v60 = vld [vmem:[%s7711_s5 + $0x2e4] ss:$28 sps:$4 sm:$0xff]  }
 0x236   :  { %v5590_v61 = vld [vmem:[%s7711_s5 + $0x2e0] ss:$28 sps:$4 sm:$0xff]  }
 0x26e   :  { %v2509_v62 = vpop.f32.mrf.mxu0 }
 0x26f   :  { %v2510_v42 = vadd.f32 %v2509_v62, %v1744_v35  ;;  %v5598_v62 = vld [vmem:[%s7711_s5 + $0x2ac] ss:$28 sps:$4 sm:$0xff]  }
 0x270   :  { %v2511_v63 = vpop.f32.mrf.mxu0  ;;  %v5644_v35 = vld [vmem:[%s7711_s5 + $0xf0] ss:$28 sps:$4 sm:$0xff]  }
 0x271   :  { %v2512_v46 = vadd.f32 %v2511_v63, %v1748_v39  ;;  %v5647_v39 = vld [vmem:[%s7711_s5 + $0x430] ss:$28 sps:$4 sm:$0xff]  }
 0x272   :  { %v2513_v1 = vpop.f32.mrf.mxu0 }
 0x273   :  { %v5596_v1 = vld [vmem:[%s7711_s5 + $0x2a8] ss:$28 sps:$4 sm:$0xff]  }
 0x274   :  { %v2514_v3 = vpop.f32.mrf.mxu0 }
 0x275   :  { %v5604_v3 = vld [vmem:[%s7711_s5 + $0x274] ss:$28 sps:$4 sm:$0xff]  }
 0x277   :  { %v2468_v5 = vpop.f32.mrf.mxu1 }
 0x278   :  { %v2469_v7 = vadd.f32 %v2468_v5, %v2428_v4  ;;  %v5602_v5 = vld [vmem:[%s7711_s5 + $0x270] ss:$28 sps:$4 sm:$0xff]  }
 0x279   :  { %v2470_v11 = vpop.f32.mrf.mxu1 }
 0x27a   :  { %v4720_v12 = vmul.f32 -1.442695, %v2469_v7  ;;  %v2471_v13 = vadd.f32 %v2470_v11, %v2430_v6  ;;  %v5610_v6 = vld [vmem:[%s7711_s5 + $0x23c] ss:$28 sps:$4 sm:$0xff]   ;;  %v5616_v11 = vld [vmem:[%s7711_s5 + $0x204] ss:$28 sps:$4 sm:$0xff]  }
 0x27b   :  { %v2472_v14 = vpop.f32.mrf.mxu1 }
 0x27c   :  { %5815 = vpow2.f32 %v4720_v12  ;;  %v4721_v15 = vmul.f32 -1.442695, %v2471_v13  ;;  %v5614_v12 = vld [vmem:[%s7711_s5 + $0x200] ss:$28 sps:$4 sm:$0xff]  }
 0x27d   :  { %v2473_v17 = vpop.f32.mrf.mxu1 }
 0x27e   :  { %5817 = vpow2.f32 %v4721_v15  ;;  %v5620_v15 = vld [vmem:[%s7711_s5 + $0x1c8] ss:$28 sps:$4 sm:$0xff]  }
 0x289   :  { %v5816_v18 = vpop.eup %5815 }
 0x28a   :  { %v2569_v21 = vadd.f32 1.0, %v5816_v18 }
 0x28b   :  { %v5818_v22 = vpop.eup %5817 }
 0x28c   :  { %5819 = vrcp.f32 %v2569_v21  ;;  %v2570_v10 = vadd.f32 1.0, %v5818_v22  ;;  %v5628_v21 = vld [vmem:[%s7711_s5 + $0x19c] ss:$28 sps:$4 sm:$0xff]  }
 0x28e   :  { %5821 = vrcp.f32 %v2570_v10 }
 0x299   :  { %v5820_v24 = vpop.eup %5819 }
 0x29a   :  { %v2581_v27 = vmul.f32 %v5820_v24, %v2469_v7  ;;  %v5608_v7 = vld [vmem:[%s7711_s5 + $0x238] ss:$28 sps:$4 sm:$0xff]   ;;  %v5623_v24 = vld [vmem:[%s7711_s5 + $0x510] ss:$28 sps:$4 sm:$0xff]  }
 0x29b   :  { %v5822_v25 = vpop.eup %5821 }
 0x29c   :  { %v2582_v28 = vmul.f32 %v5822_v25, %v2471_v13  ;;  %v7166_v9 = vpack.c.bf16 %v2581_v27, %v2581_v27  ;;  %v5622_v13 = vld [vmem:[%s7711_s5 + $0x1cc] ss:$28 sps:$4 sm:$0xff]   ;;  %v5626_v27 = vld [vmem:[%s7711_s5 + $0x198] ss:$28 sps:$4 sm:$0xff]  }
 0x29e   :  { %v7161_v29 = vpack.c.bf16 %v2582_v28, %v2582_v28  ;;  %v5631_v28 = vld [vmem:[%s7711_s5 + $0x4dc] ss:$28 sps:$4 sm:$0xff]  }
 0x2a0   :  { %4066 = vmatprep.mubr.bf16.mxu0 %v7161_v29 }
 0x2a1   :  { %4067 = vmatmul.mubr.bf16.vlgmr.msra.gmra.mxu0 %v7166_v9 }
 0x2a2   :  { %4117 = vmatpush1.bf16.msra.mxu0 %v5530_v30  ;;  %4148 = vmatprep.mubr.bf16.mxu0 %v7161_v29  ;;  %v5634_v30 = vld [vmem:[%s7711_s5 + $0x164] ss:$28 sps:$4 sm:$0xff]  }
 0x2a3   :  { %4118 = vmatprep.subr.bf16.mxu0 %v5538_v16  ;;  %v5629_v16 = vld [vmem:[%s7711_s5 + $0x4d8] ss:$28 sps:$4 sm:$0xff]  }
 0x2a6   :  { %4119 = vmatpush1.bf16.msra.mxu0 %v5536_v52  ;;  %v5632_v52 = vld [vmem:[%s7711_s5 + $0x160] ss:$28 sps:$4 sm:$0xff]  }
 0x2a7   :  { %4120 = vmatprep.subr.bf16.mxu0 %v5544_v19  ;;  %v5637_v19 = vld [vmem:[%s7711_s5 + $0x4a4] ss:$28 sps:$4 sm:$0xff]  }
 0x2aa   :  { %4121 = vmatpush1.bf16.msra.mxu0 %v5542_v20  ;;  %v5640_v20 = vld [vmem:[%s7711_s5 + $0x12c] ss:$28 sps:$4 sm:$0xff]  }
 0x2ab   :  { %4122 = vmatprep.subr.bf16.mxu0 %v5550_v31  ;;  %v5635_v31 = vld [vmem:[%s7711_s5 + $0x4a0] ss:$28 sps:$4 sm:$0xff]  }
 0x2ae   :  { %4123 = vmatpush1.bf16.msra.mxu0 %v5548_v32  ;;  %v5638_v32 = vld [vmem:[%s7711_s5 + $0x128] ss:$28 sps:$4 sm:$0xff]  }
 0x2af   :  { %4124 = vmatprep.subr.bf16.mxu0 %v5556_v33  ;;  %v5643_v33 = vld [vmem:[%s7711_s5 + $0x46c] ss:$28 sps:$4 sm:$0xff]  }
 0x2b2   :  { %4125 = vmatpush1.bf16.msra.mxu0 %v5554_v8  ;;  %v5646_v8 = vld [vmem:[%s7711_s5 + $0xf4] ss:$28 sps:$4 sm:$0xff]  }
 0x2b3   :  { %4126 = vmatprep.subr.bf16.mxu0 %v5562_v34  ;;  %v5641_v34 = vld [vmem:[%s7711_s5 + $0x468] ss:$28 sps:$4 sm:$0xff]  }
 0x2b6   :  { %4127 = vmatpush1.bf16.msra.mxu0 %v5560_v36  ;;  %v5649_v36 = vld [vmem:[%s7711_s5 + $0x434] ss:$28 sps:$4 sm:$0xff]  }
 0x2b7   :  { %v2550_v44 = vpop.f32.mrf.mxu1  ;;  %4128 = vmatprep.subr.bf16.mxu0 %v5568_v41  ;;  %v5652_v41 = vld [vmem:[%s7711_s5 + $0xbc] ss:$28 sps:$4 sm:$0xff]  }
 0x2b8   :  { %v2551_v47 = vadd.f32 %v2550_v44, %v2510_v42  ;;  %v5650_v42 = vld [vmem:[%s7711_s5 + $0xb8] ss:$28 sps:$4 sm:$0xff]   ;;  %v5658_v44 = vld [vmem:[%s7711_s5 + $0x84] ss:$28 sps:$4 sm:$0xff]  }
 0x2b9   :  { %v2552_v48 = vpop.f32.mrf.mxu1 }
 0x2ba   :  { %v4722_v49 = vmul.f32 -1.442695, %v2551_v47  ;;  %v2553_v50 = vadd.f32 %v2552_v48, %v2512_v46  ;;  %4129 = vmatpush1.bf16.msra.mxu0 %v5566_v43  ;;  %v5655_v43 = vld [vmem:[%s7711_s5 + $0x3fc] ss:$28 sps:$4 sm:$0xff]   ;;  %v5664_v48 = vld [vmem:[%s7711_s5 + $0x4c] ss:$28 sps:$4 sm:$0xff]  }
 0x2bb   :  { %v2554_v53 = vpop.f32.mrf.mxu1  ;;  %4130 = vmatprep.subr.bf16.mxu0 %v5574_v45  ;;  %v5653_v45 = vld [vmem:[%s7711_s5 + $0x3f8] ss:$28 sps:$4 sm:$0xff]   ;;  %v5656_v46 = vld [vmem:[%s7711_s5 + $0x80] ss:$28 sps:$4 sm:$0xff]  }
 0x2bc   :  { %5823 = vpow2.f32 %v4722_v49  ;;  %v4723_v55 = vmul.f32 -1.442695, %v2553_v50  ;;  %v5659_v49 = vld [vmem:[%s7711_s5 + $0x3c0] ss:$28 sps:$4 sm:$0xff]   ;;  %v5670_v53 = vld [vmem:[%s7711_s5 + $0x14] ss:$28 sps:$4 sm:$0xff]  }
 0x2bd   :  { %v2555_v56 = vpop.f32.mrf.mxu1 }
 0x2be   :  { %5825 = vpow2.f32 %v4723_v55  ;;  %4131 = vmatpush1.bf16.msra.mxu0 %v5572_v51  ;;  %v5667_v51 = vld [vmem:[%s7711_s5 + $0x38c] ss:$28 sps:$4 sm:$0xff]   ;;  %v5673_v56 = vld [vmem:[%s7711_s5 + $0x6d4] ss:$28 sps:$4 sm:$0xff]  }
 0x2bf   :  { %4132 = vmatprep.subr.bf16.mxu0 %v5580_v54  ;;  %v5665_v54 = vld [vmem:[%s7711_s5 + $0x388] ss:$28 sps:$4 sm:$0xff]   ;;  %v5668_v55 = vld [vmem:[%s7711_s5 + $0x10] ss:$28 sps:$4 sm:$0xff]  }
 0x2c2   :  { %4133 = vmatpush2.bf16.msra.mxu0 %v5578_v57  ;;  %v5676_v57 = vld [vmem:[%s7711_s5 + $0x35c] ss:$28 sps:$4 sm:$0xff]  }
 0x2c3   :  { %4134 = vmatprep.subr.bf16.mxu0 %v5586_v58  ;;  %v5671_v58 = vld [vmem:[%s7711_s5 + $0x6d0] ss:$28 sps:$4 sm:$0xff]  }
 0x2c6   :  { %4135 = vmatpush2.bf16.msra.mxu0 %v5584_v59  ;;  %v5674_v59 = vld [vmem:[%s7711_s5 + $0x358] ss:$28 sps:$4 sm:$0xff]  }
 0x2c7   :  { %4136 = vmatprep.subr.bf16.mxu0 %v5592_v60  ;;  %v5679_v60 = vld [vmem:[%s7711_s5 + $0x69c] ss:$28 sps:$4 sm:$0xff]  }
 0x2c9   :  { %v5824_v63 = vpop.eup %5823 }
 0x2ca   :  { %v2571_v0 = vadd.f32 1.0, %v5824_v63  ;;  %4137 = vmatpush2.bf16.msra.mxu0 %v5590_v61  ;;  %v5682_v61 = vld [vmem:[%s7711_s5 + $0x324] ss:$28 sps:$4 sm:$0xff]  }
 0x2cb   :  { %v5826_v2 = vpop.eup %5825  ;;  %4138 = vmatprep.subr.bf16.mxu0 %v5598_v62  ;;  %v5677_v62 = vld [vmem:[%s7711_s5 + $0x698] ss:$28 sps:$4 sm:$0xff]   ;;  %v5680_v63 = vld [vmem:[%s7711_s5 + $0x320] ss:$28 sps:$4 sm:$0xff]  }
 0x2cc   :  { %5827 = vrcp.f32 %v2571_v0  ;;  %v2572_v4 = vadd.f32 1.0, %v5826_v2  ;;  %v5685_v0 = vld [vmem:[%s7711_s5 + $0x664] ss:$28 sps:$4 sm:$0xff]  }
 0x2cd   :  { %v5683_v2 = vld [vmem:[%s7711_s5 + $0x660] ss:$28 sps:$4 sm:$0xff]  }
 0x2ce   :  { %5829 = vrcp.f32 %v2572_v4  ;;  %4139 = vmatpush2.bf16.msra.mxu0 %v5596_v1  ;;  %v5688_v1 = vld [vmem:[%s7711_s5 + $0x2ec] ss:$28 sps:$4 sm:$0xff]  }
 0x2cf   :  { %4140 = vmatprep.subr.bf16.mxu0 %v5604_v3  ;;  %v5686_v3 = vld [vmem:[%s7711_s5 + $0x2e8] ss:$28 sps:$4 sm:$0xff]  }
 0x2d0   :  { %v5691_v4 = vld [vmem:[%s7711_s5 + $0x62c] ss:$28 sps:$4 sm:$0xff]  }
 0x2d2   :  { %4141 = vmatpush2.bf16.msra.mxu0 %v5602_v5  ;;  %v5694_v5 = vld [vmem:[%s7711_s5 + $0x2b4] ss:$28 sps:$4 sm:$0xff]  }
 0x2d3   :  { %4142 = vmatprep.subr.bf16.mxu0 %v5610_v6  ;;  %v5689_v6 = vld [vmem:[%s7711_s5 + $0x628] ss:$28 sps:$4 sm:$0xff]  }
 0x2d6   :  { %4143 = vmatpush2.bf16.msra.mxu0 %v5608_v7  ;;  %v5692_v7 = vld [vmem:[%s7711_s5 + $0x2b0] ss:$28 sps:$4 sm:$0xff]  }
 0x2d7   :  { %4144 = vmatprep.subr.bf16.mxu0 %v5616_v11  ;;  %v5697_v11 = vld [vmem:[%s7711_s5 + $0x5f4] ss:$28 sps:$4 sm:$0xff]  }
 0x2d9   :  { %v5828_v14 = vpop.eup %5827 }
 0x2da   :  { %4145 = vmatpush2.bf16.msra.mxu0 %v5614_v12  ;;  %v2583_v18 = vmul.f32 %v5828_v14, %v2551_v47  ;;  %v5661_v47 = vld [vmem:[%s7711_s5 + $0x3c4] ss:$28 sps:$4 sm:$0xff]   ;;  %v5700_v12 = vld [vmem:[%s7711_s5 + $0x27c] ss:$28 sps:$4 sm:$0xff]  }
 0x2db   :  { %v5830_v17 = vpop.eup %5829  ;;  %4146 = vmatprep.subr.bf16.mxu0 %v5622_v13  ;;  %v5695_v13 = vld [vmem:[%s7711_s5 + $0x5f0] ss:$28 sps:$4 sm:$0xff]   ;;  %v5698_v14 = vld [vmem:[%s7711_s5 + $0x278] ss:$28 sps:$4 sm:$0xff]  }
 0x2dc   :  { %v2584_v22 = vmul.f32 %v5830_v17, %v2553_v50  ;;  %v7273_v25 = vpack.c.bf16 %v2583_v18, %v2583_v18  ;;  %v5662_v50 = vld [vmem:[%s7711_s5 + $0x48] ss:$28 sps:$4 sm:$0xff]   ;;  %v5701_v18 = vld [vmem:[%s7711_s5 + $0x5b8] ss:$28 sps:$4 sm:$0xff]  }
 0x2dd   :  { %v5706_v17 = vld [vmem:[%s7711_s5 + $0x244] ss:$28 sps:$4 sm:$0xff]  }
 0x2de   :  { %v7268_v10 = vpack.c.bf16 %v2584_v22, %v2584_v22  ;;  %4147 = vmatpush2.bf16.msra.mxu0 %v5620_v15  ;;  %v5703_v15 = vld [vmem:[%s7711_s5 + $0x5bc] ss:$28 sps:$4 sm:$0xff]   ;;  %v5709_v22 = vld [vmem:[%s7711_s5 + $0x584] ss:$28 sps:$4 sm:$0xff]  }
 0x2df   :  { %4198 = vmatprep.subr.bf16.mxu0 %v5628_v21  ;;  %v5704_v21 = vld [vmem:[%s7711_s5 + $0x240] ss:$28 sps:$4 sm:$0xff]  }
 0x2e0   :  { %4107 = vmatprep.mubr.bf16.mxu1 %v7268_v10 }
 0x2e1   :  { %4108 = vmatmul.mubr.bf16.vlgmr.msra.gmra.mxu1 %v7273_v25  ;;  %4149 = vmatmul.mubr.bf16.vlgmr.msra.gmra.mxu0 %v7166_v9 }
 0x2e2   :  { %4158 = vmatpush1.bf16.msra.mxu1 %v5623_v24  ;;  %4189 = vmatprep.mubr.bf16.mxu1 %v7268_v10  ;;  %v5712_v24 = vld [vmem:[%s7711_s5 + $0x20c] ss:$28 sps:$4 sm:$0xff]  }
 0x2e3   :  { %4199 = vmatpush1.bf16.msra.mxu0 %v5626_v27  ;;  %4230 = vmatprep.mubr.bf16.mxu0 %v7161_v29  ;;  %v5707_v27 = vld [vmem:[%s7711_s5 + $0x580] ss:$28 sps:$4 sm:$0xff]  }
 0x2e4   :  { %4159 = vmatprep.subr.bf16.mxu1 %v5631_v28  ;;  %4200 = vmatprep.subr.bf16.mxu0 %v5634_v30  ;;  %v5710_v28 = vld [vmem:[%s7711_s5 + $0x208] ss:$28 sps:$4 sm:$0xff]  }
 0x2e5   :  { %v5715_v30 = vld [vmem:[%s7711_s5 + $0x54c] ss:$28 sps:$4 sm:$0xff]  }
 0x2e6   :  { %4160 = vmatpush1.bf16.msra.mxu1 %v5629_v16  ;;  %v5718_v16 = vld [vmem:[%s7711_s5 + $0x1d4] ss:$28 sps:$4 sm:$0xff]  }
 0x2e7   :  { %4201 = vmatpush1.bf16.msra.mxu0 %v5632_v52  ;;  %4161 = vmatprep.subr.bf16.mxu1 %v5637_v19  ;;  %v5713_v52 = vld [vmem:[%s7711_s5 + $0x548] ss:$28 sps:$4 sm:$0xff]   ;;  %v5716_v19 = vld [vmem:[%s7711_s5 + $0x1d0] ss:$28 sps:$4 sm:$0xff]  }
 0x2e8   :  { %4202 = vmatprep.subr.bf16.mxu0 %v5640_v20  ;;  %v5721_v20 = vld [vmem:[%s7711_s5 + $0x51c] ss:$28 sps:$4 sm:$0xff]  }
 0x2ea   :  { %4162 = vmatpush1.bf16.msra.mxu1 %v5635_v31  ;;  %v5722_v31 = vld [vmem:[%s7711_s5 + $0x360] ss:$28 sps:$4 sm:$0xff]  }
 0x2eb   :  { %4203 = vmatpush1.bf16.msra.mxu0 %v5638_v32  ;;  %4163 = vmatprep.subr.bf16.mxu1 %v5643_v33  ;;  %v5719_v32 = vld [vmem:[%s7711_s5 + $0x518] ss:$28 sps:$4 sm:$0xff]   ;;  %v5723_v33 = vld [vmem:[%s7711_s5 + $0x1a0] ss:$28 sps:$4 sm:$0xff]  }
 0x2ec   :  { %4204 = vmatprep.subr.bf16.mxu0 %v5646_v8  ;;  %v5726_v8 = vld [vmem:[%s7711_s5 + $0x4e4] ss:$28 sps:$4 sm:$0xff]  }
 0x2ee   :  { %4164 = vmatpush1.bf16.msra.mxu1 %v5641_v34  ;;  %v5727_v34 = vld [vmem:[%s7711_s5 + $0x328] ss:$28 sps:$4 sm:$0xff]  }
 0x2ef   :  { %4205 = vmatpush1.bf16.msra.mxu0 %v5644_v35  ;;  %4165 = vmatprep.subr.bf16.mxu1 %v5649_v36  ;;  %v5724_v35 = vld [vmem:[%s7711_s5 + $0x4e0] ss:$28 sps:$4 sm:$0xff]   ;;  %v5728_v36 = vld [vmem:[%s7711_s5 + $0x168] ss:$28 sps:$4 sm:$0xff]  }
 0x2f0   :  { %4206 = vmatprep.subr.bf16.mxu0 %v5652_v41  ;;  %v5731_v41 = vld [vmem:[%s7711_s5 + $0x4ac] ss:$28 sps:$4 sm:$0xff]  }
 0x2f2   :  { %4166 = vmatpush1.bf16.msra.mxu1 %v5647_v39  ;;  %v5732_v39 = vld [vmem:[%s7711_s5 + $0x2f0] ss:$28 sps:$4 sm:$0xff]  }
 0x2f3   :  { %4207 = vmatpush1.bf16.msra.mxu0 %v5650_v42  ;;  %4167 = vmatprep.subr.bf16.mxu1 %v5655_v43  ;;  %v5729_v42 = vld [vmem:[%s7711_s5 + $0x4a8] ss:$28 sps:$4 sm:$0xff]   ;;  %v5733_v43 = vld [vmem:[%s7711_s5 + $0x130] ss:$28 sps:$4 sm:$0xff]  }
 0x2f4   :  { %4208 = vmatprep.subr.bf16.mxu0 %v5658_v44  ;;  %v5737_v44 = vld [vmem:[%s7711_s5 + $0x2b8] ss:$28 sps:$4 sm:$0xff]  }
 0x2f6   :  { %4168 = vmatpush1.bf16.msra.mxu1 %v5653_v45  ;;  %v5734_v45 = vld [vmem:[%s7711_s5 + $0x470] ss:$28 sps:$4 sm:$0xff]  }
 0x2f7   :  { %4209 = vmatpush1.bf16.msra.mxu0 %v5656_v46  ;;  %4169 = vmatprep.subr.bf16.mxu1 %v5661_v47  ;;  %v5738_v46 = vld [vmem:[%s7711_s5 + $0xf8] ss:$28 sps:$4 sm:$0xff]  }
 0x2f8   :  { %4210 = vmatprep.subr.bf16.mxu0 %v5664_v48  ;;  %v5741_v47 = vld [vmem:[%s7711_s5 + $0x43c] ss:$28 sps:$4 sm:$0xff]  }
 0x2f9   :  { %v5742_v48 = vld [vmem:[%s7711_s5 + $0x280] ss:$28 sps:$4 sm:$0xff]  }
 0x2fa   :  { %4170 = vmatpush1.bf16.msra.mxu1 %v5659_v49  ;;  %v5739_v49 = vld [vmem:[%s7711_s5 + $0x438] ss:$28 sps:$4 sm:$0xff]  }
 0x2fb   :  { %4211 = vmatpush1.bf16.msra.mxu0 %v5662_v50  ;;  %4171 = vmatprep.subr.bf16.mxu1 %v5667_v51  ;;  %v5743_v50 = vld [vmem:[%s7711_s5 + $0xc0] ss:$28 sps:$4 sm:$0xff]  }
 0x2fc   :  { %4212 = vmatprep.subr.bf16.mxu0 %v5670_v53  ;;  %v5746_v51 = vld [vmem:[%s7711_s5 + $0x404] ss:$28 sps:$4 sm:$0xff]  }
 0x2fd   :  { %v5747_v53 = vld [vmem:[%s7711_s5 + $0x248] ss:$28 sps:$4 sm:$0xff]  }
 0x2fe   :  { %4172 = vmatpush1.bf16.msra.mxu1 %v5665_v54  ;;  %v5744_v54 = vld [vmem:[%s7711_s5 + $0x400] ss:$28 sps:$4 sm:$0xff]  }
 0x2ff   :  { %4213 = vmatpush1.bf16.msra.mxu0 %v5668_v55  ;;  %4173 = vmatprep.subr.bf16.mxu1 %v5673_v56  ;;  %v5748_v55 = vld [vmem:[%s7711_s5 + $0x88] ss:$28 sps:$4 sm:$0xff]  }
 0x300   :  { %4214 = vmatprep.subr.bf16.mxu0 %v5676_v57  ;;  %v5751_v56 = vld [vmem:[%s7711_s5 + $0x3cc] ss:$28 sps:$4 sm:$0xff]  }
 0x301   :  { %v5752_v57 = vld [vmem:[%s7711_s5 + $0x210] ss:$28 sps:$4 sm:$0xff]  }
 0x302   :  { %4174 = vmatpush2.bf16.msra.mxu1 %v5671_v58  ;;  %v5749_v58 = vld [vmem:[%s7711_s5 + $0x3c8] ss:$28 sps:$4 sm:$0xff]  }
 0x303   :  { %4215 = vmatpush2.bf16.msra.mxu0 %v5674_v59  ;;  %4175 = vmatprep.subr.bf16.mxu1 %v5679_v60  ;;  %v5753_v59 = vld [vmem:[%s7711_s5 + $0x50] ss:$28 sps:$4 sm:$0xff]  }
 0x304   :  { %4216 = vmatprep.subr.bf16.mxu0 %v5682_v61  ;;  %v5756_v60 = vld [vmem:[%s7711_s5 + $0x394] ss:$28 sps:$4 sm:$0xff]  }
 0x305   :  { %v5757_v61 = vld [vmem:[%s7711_s5 + $0x1d8] ss:$28 sps:$4 sm:$0xff]  }
 0x306   :  { %4176 = vmatpush2.bf16.msra.mxu1 %v5677_v62  ;;  %v5754_v62 = vld [vmem:[%s7711_s5 + $0x390] ss:$28 sps:$4 sm:$0xff]  }
 0x307   :  { %4217 = vmatpush2.bf16.msra.mxu0 %v5680_v63  ;;  %4177 = vmatprep.subr.bf16.mxu1 %v5685_v0  ;;  %v5758_v63 = vld [vmem:[%s7711_s5 + $0x18] ss:$28 sps:$4 sm:$0xff]  }
 0x308   :  { %4218 = vmatprep.subr.bf16.mxu0 %v5688_v1  ;;  %v5761_v0 = vld [vmem:[%s7711_s5 + $0x6dc] ss:$28 sps:$4 sm:$0xff]  }
 0x309   :  { %v5759_v1 = vld [vmem:[%s7711_s5 + $0x6d8] ss:$28 sps:$4 sm:$0xff]  }
 0x30a   :  { %4178 = vmatpush2.bf16.msra.mxu1 %v5683_v2  ;;  %v5764_v2 = vld [vmem:[%s7711_s5 + $0x6a4] ss:$28 sps:$4 sm:$0xff]  }
 0x30b   :  { %4219 = vmatpush2.bf16.msra.mxu0 %v5686_v3  ;;  %4179 = vmatprep.subr.bf16.mxu1 %v5691_v4  ;;  %v5762_v3 = vld [vmem:[%s7711_s5 + $0x6a0] ss:$28 sps:$4 sm:$0xff]   ;;  %v5767_v4 = vld [vmem:[%s7711_s5 + $0x66c] ss:$28 sps:$4 sm:$0xff]  }
 0x30c   :  { %4220 = vmatprep.subr.bf16.mxu0 %v5694_v5  ;;  %v5765_v5 = vld [vmem:[%s7711_s5 + $0x668] ss:$28 sps:$4 sm:$0xff]  }
 0x30e   :  { %4180 = vmatpush2.bf16.msra.mxu1 %v5689_v6  ;;  %v5770_v6 = vld [vmem:[%s7711_s5 + $0x634] ss:$28 sps:$4 sm:$0xff]  }
 0x30f   :  { %4221 = vmatpush2.bf16.msra.mxu0 %v5692_v7  ;;  %4181 = vmatprep.subr.bf16.mxu1 %v5697_v11  ;;  %v5773_v7 = vld [vmem:[%s7711_s5 + $0x5fc] ss:$28 sps:$4 sm:$0xff]  }
 0x310   :  { %4222 = vmatprep.subr.bf16.mxu0 %v5700_v12  ;;  %v5771_v11 = vld [vmem:[%s7711_s5 + $0x5f8] ss:$28 sps:$4 sm:$0xff]   ;;  %v5776_v12 = vld [vmem:[%s7711_s5 + $0x5c4] ss:$28 sps:$4 sm:$0xff]  }
 0x312   :  { %4182 = vmatpush2.bf16.msra.mxu1 %v5695_v13  ;;  %v5774_v13 = vld [vmem:[%s7711_s5 + $0x5c0] ss:$28 sps:$4 sm:$0xff]  }
 0x313   :  { %4223 = vmatpush2.bf16.msra.mxu0 %v5698_v14  ;;  %4183 = vmatprep.subr.bf16.mxu1 %v5703_v15  ;;  %v5779_v14 = vld [vmem:[%s7711_s5 + $0x58c] ss:$28 sps:$4 sm:$0xff]  }
 0x314   :  { %4224 = vmatprep.subr.bf16.mxu0 %v5706_v17  ;;  %v5777_v15 = vld [vmem:[%s7711_s5 + $0x588] ss:$28 sps:$4 sm:$0xff]   ;;  %v5782_v17 = vld [vmem:[%s7711_s5 + $0x554] ss:$28 sps:$4 sm:$0xff]  }
 0x316   :  { %4184 = vmatpush2.bf16.msra.mxu1 %v5701_v18  ;;  %v5780_v18 = vld [vmem:[%s7711_s5 + $0x550] ss:$28 sps:$4 sm:$0xff]  }
 0x317   :  { %4225 = vmatpush2.bf16.msra.mxu0 %v5704_v21  ;;  %4185 = vmatprep.subr.bf16.mxu1 %v5709_v22  ;;  %v5783_v21 = vld [vmem:[%s7711_s5 + $0x6e0] ss:$28 sps:$4 sm:$0xff]  }
 0x318   :  { %4226 = vmatprep.subr.bf16.mxu0 %v5712_v24  ;;  %v5784_v22 = vld [vmem:[%s7711_s5 + $0x520] ss:$28 sps:$4 sm:$0xff]   ;;  %v5785_v24 = vld [vmem:[%s7711_s5 + $0x6a8] ss:$28 sps:$4 sm:$0xff]  }
 0x31a   :  { %4186 = vmatpush2.bf16.msra.mxu1 %v5707_v27 }
 0x31b   :  { %4227 = vmatpush2.bf16.msra.mxu0 %v5710_v28  ;;  %4187 = vmatprep.subr.bf16.mxu1 %v5715_v30  ;;  %v5786_v28 = vld [vmem:[%s7711_s5 + $0x4e8] ss:$28 sps:$4 sm:$0xff]  }
 0x31c   :  { %4228 = vmatprep.subr.bf16.mxu0 %v5718_v16  ;;  %v5787_v16 = vld [vmem:[%s7711_s5 + $0x670] ss:$28 sps:$4 sm:$0xff]  }
 0x31e   :  { %4188 = vmatpush2.bf16.msra.mxu1 %v5713_v52 }
 0x31f   :  { %4229 = vmatpush2.bf16.msra.mxu0 %v5716_v19  ;;  %4239 = vmatprep.subr.bf16.mxu1 %v5721_v20  ;;  %v5788_v19 = vld [vmem:[%s7711_s5 + $0x4b0] ss:$28 sps:$4 sm:$0xff]  }
 0x320   :  { %4948 = vmatprep.subr.bf16.mxu0 %v5722_v31  ;;  %v5790_v31 = vld [vmem:[%s7711_s5 + $0x478] ss:$28 sps:$4 sm:$0xff]  }
 0x321   :  { %4190 = vmatmul.mubr.bf16.vlgmr.msra.gmra.mxu1 %v7273_v25 }
 0x322   :  { %4231 = vmatmul.mubr.bf16.vlgmr.msra.gmra.mxu0 %v7166_v9  ;;  %4240 = vmatpush1.bf16.msra.mxu1 %v5719_v32  ;;  %v5791_v32 = vld [vmem:[%s7711_s5 + $0x600] ss:$28 sps:$4 sm:$0xff]  }
 0x323   :  { %4271 = vmatprep.mubr.bf16.mxu1 %v7268_v10  ;;  %4949 = vmatpush3.bf16.msra.mxu0 %v5723_v33  ;;  %v5792_v33 = vld [vmem:[%s7711_s5 + $0x440] ss:$28 sps:$4 sm:$0xff]  }
 0x324   :  { %4312 = vmatprep.mubr.bf16.mxu0 %v7161_v29  ;;  %4241 = vmatprep.subr.bf16.mxu1 %v5726_v8  ;;  %v5736_v29 = vld [vmem:[%s7711_s5 + $0x474] ss:$28 sps:$4 sm:$0xff]   ;;  %v5793_v8 = vld [vmem:[%s7711_s5 + $0x5c8] ss:$28 sps:$4 sm:$0xff]  }
 0x325   :  { %4950 = vmatprep.subr.bf16.mxu0 %v5727_v34  ;;  %v5794_v34 = vld [vmem:[%s7711_s5 + $0x408] ss:$28 sps:$4 sm:$0xff]  }
 0x326   :  { %4242 = vmatpush1.bf16.msra.mxu1 %v5724_v35  ;;  %v5795_v35 = vld [vmem:[%s7711_s5 + $0x590] ss:$28 sps:$4 sm:$0xff]  }
 0x327   :  { %4951 = vmatpush3.bf16.msra.mxu0 %v5728_v36  ;;  %4243 = vmatprep.subr.bf16.mxu1 %v5731_v41  ;;  %v5796_v36 = vld [vmem:[%s7711_s5 + $0x3d0] ss:$28 sps:$4 sm:$0xff]   ;;  %v5797_v41 = vld [vmem:[%s7711_s5 + $0x558] ss:$28 sps:$4 sm:$0xff]  }
 0x328   :  { %4952 = vmatprep.subr.bf16.mxu0 %v5732_v39  ;;  %v5798_v39 = vld [vmem:[%s7711_s5 + $0x398] ss:$28 sps:$4 sm:$0xff]  }
 0x32a   :  { %4244 = vmatpush1.bf16.msra.mxu1 %v5729_v42  ;;  %v7666_v42 = vld [vmem:[%s7713_s6] sm:$0x7f] }
 0x32b   :  { %4953 = vmatpush3.bf16.msra.mxu0 %v5733_v43  ;;  %4245 = vmatprep.subr.bf16.mxu1 %v5736_v29  ;;  %v2850_v43 = vrot.slane %v7666_v42, %v6731_v38  ;;  %v2854_v29 = vrot.slane %v7666_v42, %v6739_v40  ;;  %v5832_v38 = vld [vmem:[%s7708_s0 + $0x8] sm:$0xff] }
 0x32c   :  { %4954 = vmatprep.subr.bf16.mxu0 %v5737_v44 }
 0x32e   :  { %4246 = vmatpush1.bf16.msra.mxu1 %v5734_v45 }
 0x32f   :  { %4955 = vmatpush3.bf16.msra.mxu0 %v5738_v46  ;;  %4247 = vmatprep.subr.bf16.mxu1 %v5741_v47 }
 0x330   :  { %4956 = vmatprep.subr.bf16.mxu0 %v5742_v48 }
 0x332   :  { %4248 = vmatpush1.bf16.msra.mxu1 %v5739_v49 }
 0x333   :  { %4957 = vmatpush3.bf16.msra.mxu0 %v5743_v50  ;;  %4249 = vmatprep.subr.bf16.mxu1 %v5746_v51 }
 0x334   :  { %4958 = vmatprep.subr.bf16.mxu0 %v5747_v53 }
 0x336   :  { %4250 = vmatpush1.bf16.msra.mxu1 %v5744_v54 }
 0x337   :  { %4959 = vmatpush3.bf16.msra.mxu0 %v5748_v55  ;;  %4251 = vmatprep.subr.bf16.mxu1 %v5751_v56 }
 0x338   :  { %4960 = vmatprep.subr.bf16.mxu0 %v5752_v57 }
 0x33a   :  { %4252 = vmatpush1.bf16.msra.mxu1 %v5749_v58 }
 0x33b   :  { %4961 = vmatpush3.bf16.msra.mxu0 %v5753_v59  ;;  %4253 = vmatprep.subr.bf16.mxu1 %v5756_v60 }
 0x33c   :  { %4962 = vmatprep.subr.bf16.mxu0 %v5757_v61  ;;  %v2858_v61 = vrot.slane %v7666_v42, %v6784_v23  ;;  %v5834_v23 = vld [vmem:[%s7708_s0 + $0x18] sm:$0xff] }
 0x33e   :  { %4254 = vmatpush1.bf16.msra.mxu1 %v5754_v62  ;;  %v2862_v62 = vrot.slane %v7666_v42, %v6793_v26 }
 0x33f   :  { %4963 = vmatpush3.bf16.msra.mxu0 %v5758_v63  ;;  %4255 = vmatprep.subr.bf16.mxu1 %v5761_v0 }
 0x342   :  { %4256 = vmatpush2.bf16.msra.mxu1 %v5759_v1  ;;  %4313 = vmatmul.mubr.bf16.vlgmr.msra.gmra.mxu0 %v7166_v9  ;;  %v5768_v9 = vld [vmem:[%s7711_s5 + $0x630] ss:$28 sps:$4 sm:$0xff]  }
 0x343   :  { %4257 = vmatprep.subr.bf16.mxu1 %v5764_v2 }
 0x346   :  { %4258 = vmatpush2.bf16.msra.mxu1 %v5762_v3 }
 0x347   :  { %4259 = vmatprep.subr.bf16.mxu1 %v5767_v4 }
 0x34a   :  { %4260 = vmatpush2.bf16.msra.mxu1 %v5765_v5  ;;  %v5833_v5 = vld [vmem:[%s7708_s0 + $0x10] sm:$0xff] }
 0x34b   :  { %4261 = vmatprep.subr.bf16.mxu1 %v5770_v6 }
 0x34e   :  { %4262 = vmatpush2.bf16.msra.mxu1 %v5768_v9 }
 0x34f   :  { %4263 = vmatprep.subr.bf16.mxu1 %v5773_v7 }
 0x352   :  { %4264 = vmatpush2.bf16.msra.mxu1 %v5771_v11 }
 0x353   :  { %4265 = vmatprep.subr.bf16.mxu1 %v5776_v12 }
 0x356   :  { %4266 = vmatpush2.bf16.msra.mxu1 %v5774_v13 }
 0x357   :  { %4267 = vmatprep.subr.bf16.mxu1 %v5779_v14 }
 0x35a   :  { %4268 = vmatpush2.bf16.msra.mxu1 %v5777_v15 }
 0x35b   :  { %4269 = vmatprep.subr.bf16.mxu1 %v5782_v17 }
 0x35e   :  { %4270 = vmatpush2.bf16.msra.mxu1 %v5780_v18 }
 0x35f   :  { %4970 = vmatprep.subr.bf16.mxu1 %v5783_v21 }
 0x361   :  { %4272 = vmatmul.mubr.bf16.vlgmr.msra.gmra.mxu1 %v7273_v25  ;;  %v4068_v27 = vpop.f32.mrf.mxu0 }
 0x362   :  { %4971 = vmatpush3.bf16.msra.mxu1 %v5784_v22  ;;  %4352 = vmatprep.mubr.bf16.mxu1 %v7268_v10  ;;  %v5789_v10 = vld [vmem:[%s7711_s5 + $0x638] ss:$28 sps:$4 sm:$0xff]   ;;  %v4069_v44 = vadd.f32 %v4068_v27, %v2850_v43 }
 0x363   :  { %v4070_v30 = vpop.f32.mrf.mxu0  ;;  %4972 = vmatprep.subr.bf16.mxu1 %v5785_v24 }
 0x364   :  { %v4071_v47 = vadd.f32 %v4070_v30, %v2854_v29  ;;  %v2865_v30 = vsub.s32 4, %v6725_v37 }
 0x365   :  { %v4072_v52 = vpop.f32.mrf.mxu0 }
 0x366   :  { %4973 = vmatpush3.bf16.msra.mxu1 %v5786_v28  ;;  %v2866_v52 = vrot.slane %v7666_v42, %v2865_v30 }
 0x367   :  { %v4073_v20 = vpop.f32.mrf.mxu0  ;;  %4974 = vmatprep.subr.bf16.mxu1 %v5787_v16  ;;  %v2869_v16 = vsub.s32 5, %v6725_v37 }
 0x36a   :  { %4975 = vmatpush3.bf16.msra.mxu1 %v5788_v19  ;;  %v2870_v19 = vrot.slane %v7666_v42, %v2869_v16 }
 0x36b   :  { %4976 = vmatprep.subr.bf16.mxu1 %v5789_v10 }
 0x36e   :  { %4977 = vmatpush3.bf16.msra.mxu1 %v5790_v31 }
 0x36f   :  { %4978 = vmatprep.subr.bf16.mxu1 %v5791_v32 }
 0x372   :  { %4979 = vmatpush3.bf16.msra.mxu1 %v5792_v33 }
 0x373   :  { %4980 = vmatprep.subr.bf16.mxu1 %v5793_v8  ;;  %v5835_v8 = vld [vmem:[%s7708_s0 + $0x20] sm:$0xff] }
 0x376   :  { %4981 = vmatpush3.bf16.msra.mxu1 %v5794_v34 }
 0x377   :  { %4982 = vmatprep.subr.bf16.mxu1 %v5795_v35 }
 0x37a   :  { %4983 = vmatpush3.bf16.msra.mxu1 %v5796_v36 }
 0x37b   :  { %4984 = vmatprep.subr.bf16.mxu1 %v5797_v41 }
 0x37e   :  { %4985 = vmatpush3.bf16.msra.mxu1 %v5798_v39  ;;  %v5836_v39 = vld [vmem:[%s7708_s0 + $0x28] sm:$0xff] }
 0x381   :  { %4353 = vmatmul.mubr.bf16.vlgmr.msra.gmra.mxu1 %v7273_v25  ;;  %v5831_v25 = vld [vmem:[%s7708_s0] sm:$0xff] }
 0x3a1   :  { %v4109_v45 = vpop.f32.mrf.mxu1  ;;  %v4150_v46 = vpop.f32.mrf.mxu0 }
 0x3a2   :  { %v4110_v48 = vadd.f32 %v4109_v45, %v4069_v44  ;;  %v4151_v63 = vadd.f32 %v4150_v46, %v2858_v61 }
 0x3a3   :  { %v4111_v49 = vpop.f32.mrf.mxu1  ;;  %v4152_v50 = vpop.f32.mrf.mxu0 }
 0x3a4   :  { %v4360_v51 = vsub.f32 %v4110_v48, %v5831_v25  ;;  %v4112_v53 = vadd.f32 %v4111_v49, %v4071_v47  ;;  %v4153_v1 = vadd.f32 %v4152_v50, %v2862_v62  ;;  %v2873_v47 = vsub.s32 6, %v6725_v37 }
 0x3a5   :  { %v4113_v54 = vpop.f32.mrf.mxu1  ;;  %v4154_v55 = vpop.f32.mrf.mxu0 }
 0x3a6   :  { %v4361_v40 = vsub.f32 %v4112_v53, %v5832_v38  ;;  %v4367_v58 = vmul.f32 %v4360_v51, %v4360_v51  ;;  %v2874_v48 = vrot.slane %v7666_v42, %v2873_v47 }
 0x3a7   :  { %v4114_v56 = vpop.f32.mrf.mxu1  ;;  %v4155_v57 = vpop.f32.mrf.mxu0 }
 0x3a8   :  { %v4368_v59 = vmul.f32 %v4361_v40, %v4361_v40  ;;  %v5837_v40 = vld [vmem:[%s7708_s0 + $0x30] sm:$0xff] }
 0x3aa   :  { %v4374_v60 = vadd.f32 %v4368_v59, %v4367_v58 }
 0x3e1   :  { %v4191_v0 = vpop.f32.mrf.mxu1 }
 0x3e2   :  { %v4192_v2 = vadd.f32 %v4191_v0, %v4151_v63  ;;  %v4232_v3 = vpop.f32.mrf.mxu0 }
 0x3e3   :  { %v4193_v4 = vpop.f32.mrf.mxu1  ;;  %v4233_v20 = vadd.f32 %v4232_v3, %v2866_v52 }
 0x3e4   :  { %v4362_v6 = vsub.f32 %v4192_v2, %v5833_v5  ;;  %v4194_v9 = vadd.f32 %v4193_v4, %v4153_v1  ;;  %v4234_v7 = vpop.f32.mrf.mxu0 }
 0x3e5   :  { %v4195_v11 = vpop.f32.mrf.mxu1  ;;  %v4235_v31 = vadd.f32 %v4234_v7, %v2870_v19 }
 0x3e6   :  { %v4369_v12 = vmul.f32 %v4362_v6, %v4362_v6  ;;  %v4363_v26 = vsub.f32 %v4194_v9, %v5834_v23  ;;  %v4236_v13 = vpop.f32.mrf.mxu0 }
 0x3e7   :  { %v4196_v14 = vpop.f32.mrf.mxu1 }
 0x3e8   :  { %v4375_v15 = vadd.f32 %v4374_v60, %v4369_v12  ;;  %v4370_v17 = vmul.f32 %v4363_v26, %v4363_v26  ;;  %v4237_v18 = vpop.f32.mrf.mxu0 }
 0x3ea   :  { %v4376_v21 = vadd.f32 %v4375_v15, %v4370_v17 }
 0x402   :  { %v4964_v22 = vpop.f32.mrf.mxu0 }
 0x404   :  { %v4965_v24 = vpop.f32.mrf.mxu0 }
 0x405   :  { %v4966_v49 = vadd.f32 %v4965_v24, %v4964_v22 }
 0x406   :  { %v4967_v27 = vpop.f32.mrf.mxu0 }
 0x407   :  { %v4315_v51 = vadd.f32 %v4966_v49, %v2874_v48 }
 0x408   :  { %v4968_v28 = vpop.f32.mrf.mxu0 }
 0x421   :  { %v4273_v10 = vpop.f32.mrf.mxu1 }
 0x422   :  { %v4274_v32 = vadd.f32 %v4273_v10, %v4233_v20 }
 0x423   :  { %v4275_v33 = vpop.f32.mrf.mxu1 }
 0x424   :  { %v4364_v34 = vsub.f32 %v4274_v32, %v5835_v8  ;;  %v4276_v35 = vadd.f32 %v4275_v33, %v4235_v31 }
 0x425   :  { %v4277_v36 = vpop.f32.mrf.mxu1 }
 0x426   :  { %v4371_v41 = vmul.f32 %v4364_v34, %v4364_v34  ;;  %v4365_v43 = vsub.f32 %v4276_v35, %v5836_v39 }
 0x427   :  { %v4278_v29 = vpop.f32.mrf.mxu1 }
 0x428   :  { %v4372_v44 = vmul.f32 %v4365_v43, %v4365_v43  ;;  %v4377_v45 = vadd.f32 %v4376_v21, %v4371_v41 }
 0x42a   :  { %v4378_v46 = vadd.f32 %v4377_v45, %v4372_v44 }
 0x441   :  { %v4986_v50 = vpop.f32.mrf.mxu1 }
 0x443   :  { %v4987_v25 = vpop.f32.mrf.mxu1 }
 0x444   :  { %v4988_v53 = vadd.f32 %v4987_v25, %v4986_v50 }
 0x445   :  { %v4989_v54 = vpop.f32.mrf.mxu1 }
 0x446   :  { %v4355_v55 = vadd.f32 %v4988_v53, %v4315_v51 }
 0x447   :  { %v4990_v38 = vpop.f32.mrf.mxu1 }
 0x448   :  { %v4366_v56 = vsub.f32 %v4355_v55, %v5837_v40 }
 0x44a   :  { %v4373_v57 = vmul.f32 %v4366_v56, %v4366_v56 }
 0x44c   :  { %v4379_v58 = vsel %vm1239_vm0, %v4373_v57, 0.0 }
 0x44d   :  { %v4380_v59 = vadd.f32 %v4379_v58, %v4378_v46 }
 0x44f   :  { %4381 = vadd.xlane.f32.xlu0 %v4380_v59 }
 0x4d8   :  { %v4382_v37 = vpop.xlane.xlu0 %4381 }
 0x4d9   :  { %v4383_v42 = vmul.f32 50.0, %v4382_v37 }
 0x4db   :  { %4385 = vst.msk [vmem:[%s7714_s7] sm:$0xff] %vm4384_vm1, %v4383_v42 }

</bundles_post_ra>
